<compile_context>
chip_gen: v7x
topology: tpu7x:2x2x1
jax: 0.10.0
libtpu: 0.0.40
codegen_flags: <defaults>
</compile_context>

<pallas_src>
import jax
import jax.numpy as jnp
import numpy as np
from jax.experimental import pallas as pl
from jax.experimental.pallas import tpu as pltpu


def lstm2_imdb_kernel(x_ref, wih1_ref, whh1_ref, b1_ref,
                      wih2_ref, whh2_ref, b2_ref, wlin_ref, blin_ref,
                      out_ref):
    T, B, E = x_ref.shape
    H = whh1_ref.shape[0]
    G = 4 * H
    bf16 = jnp.bfloat16

    # ---- load weights once (everything resident in VMEM, already bf16) ----
    whh1 = whh1_ref[...]                                  # (H, 4H) bf16
    wih2 = wih2_ref[...]                                  # (H, 4H) bf16
    whh2 = whh2_ref[...]                                  # (H, 4H) bf16
    b2b = jnp.broadcast_to(b2_ref[...], (B, G))           # hoisted bias bcast (f32)

    # ---- prologue: layer-1 input projection for ALL timesteps at once ----
    x2 = x_ref[...].reshape(T * B, E)                     # bf16, layout-preserving
    xp = jnp.dot(x2, wih1_ref[...], preferred_element_type=jnp.float32)
    xp = (xp + b1_ref[...]).reshape(T, B, G)              # (T, B, 4H) f32

    # Gate layout is [i | f | g | o]; only the g lanes use tanh, the rest use
    # sigmoid.  sigmoid(x) = 0.5*tanh(x/2) + 0.5, so one full-vreg tanh with a
    # pre-scale m and a post add a covers all four gates in a single EUP pass:
    #   act = tanh(gates * m) * m + a,   m = (g? 1 : 0.5),  a = (g? 0 : 0.5)
    lane = jax.lax.broadcasted_iota(jnp.int32, (B, G), 1)
    g_mask = (lane >= 2 * H) & (lane < 3 * H)
    m = jnp.where(g_mask, jnp.float32(1.0), jnp.float32(0.5))
    a = jnp.where(g_mask, jnp.float32(0.0), jnp.float32(0.5))

    def gate_math(gates, c_prev):
        t_ = jnp.tanh(gates * m)                          # single EUP pass
        act = t_ * m + a                                  # cheap VPU fixups
        i = act[:, 0 * H:1 * H]
        f = act[:, 1 * H:2 * H]
        g = act[:, 2 * H:3 * H]
        o = act[:, 3 * H:4 * H]
        c_new = f * c_prev + i * g
        h_new = o * jnp.tanh(c_new)
        return h_new, c_new

    zeros = jnp.zeros((B, H), jnp.float32)
    h1, c1, h2, c2 = zeros, zeros, zeros, zeros

    # Fully unrolled recurrence (T small & static); only the h @ W matmuls sit
    # on the serial dependence chain, now single bf16 MXU passes each.
    for t in range(T):
        # layer 1: x-part precomputed in the prologue
        g1 = xp[t] + jnp.dot(h1.astype(bf16), whh1,
                             preferred_element_type=jnp.float32)
        h1, c1 = gate_math(g1, c1)
        # layer 2: two dots instead of per-step concat([h1, h2]) @ W_cat2
        g2 = (jnp.dot(h1.astype(bf16), wih2,
                      preferred_element_type=jnp.float32)
              + jnp.dot(h2.astype(bf16), whh2,
                        preferred_element_type=jnp.float32)
              + b2b)
        h2, c2 = gate_math(g2, c2)

    # Classifier head on the last timestep's top-layer hidden state.
    # (B, C) = (8, 2): single masked store, not worth lane padding.
    out_ref[...] = (jnp.dot(h2.astype(bf16), wlin_ref[...],
                            preferred_element_type=jnp.float32)
                    + blin_ref[...])


def lstm2_imdb_forward(x_btE, params):
    """x_btE: (B, T, E) batch_first like PyTorch. Returns (B, num_classes)."""
    B, T, E = x_btE.shape
    C = params["wlin_t"].shape[1]

    # Time-major + bf16 so per-step slabs are clean leading-dim slices and the
    # input DMA bytes are halved (tiny at these shapes; folded by XLA).
    x_tbE = jnp.swapaxes(x_btE, 0, 1).astype(jnp.bfloat16)   # (T, B, E)

    vmem_spec = lambda: pl.BlockSpec(memory_space=pltpu.MemorySpace.VMEM)
    return pl.pallas_call(
        lstm2_imdb_kernel,
        out_shape=jax.ShapeDtypeStruct((B, C), jnp.float32),
        in_specs=[vmem_spec() for _ in range(9)],
        out_specs=vmem_spec(),
        compiler_params=pltpu.CompilerParams(
            vmem_limit_bytes=32 * 1024 * 1024),
    )(x_tbE,
      params["wih1_bf"], params["whh1_bf"], params["b1"],
      params["wih2_bf"], params["whh2_bf"], params["b2"],
      params["wlin_bf"], params["blin"])


def make_params(key, embedding_dim, hidden_size, num_classes):
    """Deterministic init mirroring nn.LSTM / nn.Linear shapes (transposed for x @ W).

    f32 masters (used by the reference) plus bf16 copies pre-cast once for the
    kernel's MXU operands.
    """
    E, H, C = embedding_dim, hidden_size, num_classes
    k = 1.0 / np.sqrt(H)
    keys = jax.random.split(key, 10)
    u = lambda kk, shape: jax.random.uniform(kk, shape, jnp.float32, -k, k)
    params = {
        # layer 1: W_ih (4H, E) -> (E, 4H); W_hh (4H, H) -> (H, 4H); b = b_ih + b_hh
        "wih1_t": u(keys[0], (E, 4 * H)),
        "whh1_t": u(keys[1], (H, 4 * H)),
        "b1": u(keys[2], (1, 4 * H)) + u(keys[3], (1, 4 * H)),
        # layer 2: input size = H
        "wih2_t": u(keys[4], (H, 4 * H)),
        "whh2_t": u(keys[5], (H, 4 * H)),
        "b2": u(keys[6], (1, 4 * H)) + u(keys[7], (1, 4 * H)),
        # linear: W (C, H) -> (H, C); b (C,) -> (1, C)
        "wlin_t": u(keys[8], (H, C)),
        "blin": u(keys[9], (1, C)),
    }
    # bf16 copies for the kernel (MXU operands); biases stay f32.
    for name, src in (("wih1_bf", "wih1_t"), ("whh1_bf", "whh1_t"),
                      ("wih2_bf", "wih2_t"), ("whh2_bf", "whh2_t"),
                      ("wlin_bf", "wlin_t")):
        params[name] = params[src].astype(jnp.bfloat16)
    return params


def reference_forward(x_btE, p):
    """Pure-JAX f32 reference with identical semantics to nn.LSTM(2 layers) + Linear."""
    B, T, E = x_btE.shape
    H = p["whh1_t"].shape[0]

    def cell(x_in, h, c, wih, whh, b):
        g = x_in @ wih + h @ whh + b
        i = jax.nn.sigmoid(g[:, :H])
        f = jax.nn.sigmoid(g[:, H:2 * H])
        gg = jnp.tanh(g[:, 2 * H:3 * H])
        o = jax.nn.sigmoid(g[:, 3 * H:])
        c_new = f * c + i * gg
        return o * jnp.tanh(c_new), c_new

    def step(carry, x_t):
        h1, c1, h2, c2 = carry
        h1, c1 = cell(x_t, h1, c1, p["wih1_t"], p["whh1_t"], p["b1"])
        h2, c2 = cell(h1, h2, c2, p["wih2_t"], p["whh2_t"], p["b2"])
        return (h1, c1, h2, c2), None

    init = tuple(jnp.zeros((B, H), jnp.float32) for _ in range(4))
    (h1, c1, h2, c2), _ = jax.lax.scan(step, init, jnp.swapaxes(x_btE, 0, 1))
    return h2 @ p["wlin_t"] + p["blin"]


if __name__ == "__main__":
    # batch, seq_len, embedding_dim, hidden_size, num_classes
    B, T, E, H, C = 8, 8, 32, 32, 2

    key = jax.random.PRNGKey(0)
    kx, kp = jax.random.split(key)
    x = jax.random.normal(kx, (B, T, E), jnp.float32)
    params = make_params(kp, E, H, C)

    out = lstm2_imdb_forward(x, params)
    out = jax.block_until_ready(out)

    ref = reference_forward(x, params)
    # bf16 MXU operands (f32 accumulate / f32 elementwise) vs the f32 reference:
    # tolerance loosened from 2e-5 to 5e-2 as flagged in the perf review.
    np.testing.assert_allclose(np.asarray(out), np.asarray(ref),
                               rtol=5e-2, atol=5e-2)

    print("KERNEL_OK")
</pallas_src>

<mosaic_0001>
module attributes {stable_mosaic.version = 11 : i64} {
  func.func @lstm2_imdb_kernel(%arg0: memref<8x8x32xbf16, #tpu.memory_space<vmem>>, %arg1: memref<32x128xbf16, #tpu.memory_space<vmem>>, %arg2: memref<32x128xbf16, #tpu.memory_space<vmem>>, %arg3: memref<1x128xf32, #tpu.memory_space<vmem>>, %arg4: memref<32x128xbf16, #tpu.memory_space<vmem>>, %arg5: memref<32x128xbf16, #tpu.memory_space<vmem>>, %arg6: memref<1x128xf32, #tpu.memory_space<vmem>>, %arg7: memref<32x2xbf16, #tpu.memory_space<vmem>>, %arg8: memref<1x2xf32, #tpu.memory_space<vmem>>, %arg9: memref<8x2xf32, #tpu.memory_space<vmem>>) attributes {dimension_semantics = [], scalar_prefetch = 0 : i64, scratch_operands = 0 : i64, tpu.core_type = #tpu.core_type<tc>} {
    %c0 = arith.constant 0 : index
    %c0_0 = arith.constant 0 : index
    %0 = vector.load %arg2[%c0, %c0_0] : memref<32x128xbf16, #tpu.memory_space<vmem>>, vector<32x128xbf16>
    %c0_1 = arith.constant 0 : index
    %c0_2 = arith.constant 0 : index
    %1 = vector.load %arg4[%c0_1, %c0_2] : memref<32x128xbf16, #tpu.memory_space<vmem>>, vector<32x128xbf16>
    %c0_3 = arith.constant 0 : index
    %c0_4 = arith.constant 0 : index
    %2 = vector.load %arg5[%c0_3, %c0_4] : memref<32x128xbf16, #tpu.memory_space<vmem>>, vector<32x128xbf16>
    %c0_5 = arith.constant 0 : index
    %c0_6 = arith.constant 0 : index
    %3 = vector.load %arg6[%c0_5, %c0_6] : memref<1x128xf32, #tpu.memory_space<vmem>>, vector<1x128xf32>
    %4 = vector.shape_cast %3 : vector<1x128xf32> to vector<1x128xf32>
    %5 = vector.broadcast %4 : vector<1x128xf32> to vector<8x128xf32>
    %c0_7 = arith.constant 0 : index
    %c0_8 = arith.constant 0 : index
    %c0_9 = arith.constant 0 : index
    %6 = vector.load %arg0[%c0_7, %c0_8, %c0_9] : memref<8x8x32xbf16, #tpu.memory_space<vmem>>, vector<8x8x32xbf16>
    %7 = vector.shape_cast %6 : vector<8x8x32xbf16> to vector<64x32xbf16>
    %c0_10 = arith.constant 0 : index
    %c0_11 = arith.constant 0 : index
    %8 = vector.load %arg1[%c0_10, %c0_11] : memref<32x128xbf16, #tpu.memory_space<vmem>>, vector<32x128xbf16>
    %cst = arith.constant dense<0.000000e+00> : vector<64x128xf32>
    %9 = tpu.matmul %7, %8, %cst {dimension_numbers = #tpu.dot_dimension_numbers<[1], [0], [0], [1], [0, 0, 1, 1], [], []>} : vector<64x32xbf16>, vector<32x128xbf16>, vector<64x128xf32> -> vector<64x128xf32>
    %c0_12 = arith.constant 0 : index
    %c0_13 = arith.constant 0 : index
    %10 = vector.load %arg3[%c0_12, %c0_13] : memref<1x128xf32, #tpu.memory_space<vmem>>, vector<1x128xf32>
    %11 = vector.broadcast %10 : vector<1x128xf32> to vector<64x128xf32>
    %12 = arith.addf %9, %11 : vector<64x128xf32>
    %13 = vector.shape_cast %12 : vector<64x128xf32> to vector<8x8x128xf32>
    %14 = tpu.iota {dimensions = array<i32: 1>} : vector<8x128xi32>
    %c64_i32 = arith.constant 64 : i32
    %15 = vector.broadcast %c64_i32 : i32 to vector<8x128xi32>
    %16 = arith.cmpi sge, %14, %15 : vector<8x128xi32>
    %c96_i32 = arith.constant 96 : i32
    %17 = vector.broadcast %c96_i32 : i32 to vector<8x128xi32>
    %18 = arith.cmpi slt, %14, %17 : vector<8x128xi32>
    %19 = arith.andi %16, %18 : vector<8x128xi1>
    %cst_14 = arith.constant 1.000000e+00 : f32
    %cst_15 = arith.constant 5.000000e-01 : f32
    %20 = vector.broadcast %cst_14 : f32 to vector<8x128xf32>
    %21 = vector.broadcast %cst_15 : f32 to vector<8x128xf32>
    %22 = arith.select %19, %20, %21 : vector<8x128xi1>, vector<8x128xf32>
    %cst_16 = arith.constant 0.000000e+00 : f32
    %cst_17 = arith.constant 5.000000e-01 : f32
    %23 = vector.broadcast %cst_16 : f32 to vector<8x128xf32>
    %24 = vector.broadcast %cst_17 : f32 to vector<8x128xf32>
    %25 = arith.select %19, %23, %24 : vector<8x128xi1>, vector<8x128xf32>
    %cst_18 = arith.constant 0.000000e+00 : f32
    %26 = vector.broadcast %cst_18 : f32 to vector<8x32xf32>
    %27 = vector.extract_strided_slice %13 {offsets = [0, 0, 0], sizes = [1, 8, 128], strides = [1, 1, 1]} : vector<8x8x128xf32> to vector<1x8x128xf32>
    %28 = vector.shape_cast %27 : vector<1x8x128xf32> to vector<8x128xf32>
    %29 = arith.truncf %26 : vector<8x32xf32> to vector<8x32xbf16>
    %cst_19 = arith.constant dense<0.000000e+00> : vector<8x128xf32>
    %30 = tpu.matmul %29, %0, %cst_19 {dimension_numbers = #tpu.dot_dimension_numbers<[1], [0], [0], [1], [0, 0, 1, 1], [], []>} : vector<8x32xbf16>, vector<32x128xbf16>, vector<8x128xf32> -> vector<8x128xf32>
    %31 = arith.addf %28, %30 : vector<8x128xf32>
    %32 = arith.mulf %31, %22 : vector<8x128xf32>
    %33 = math.tanh %32 : vector<8x128xf32>
    %34 = arith.mulf %33, %22 : vector<8x128xf32>
    %35 = arith.addf %34, %25 : vector<8x128xf32>
    %36 = vector.extract_strided_slice %35 {offsets = [0, 0], sizes = [8, 32], strides = [1, 1]} : vector<8x128xf32> to vector<8x32xf32>
    %37 = vector.extract_strided_slice %35 {offsets = [0, 32], sizes = [8, 32], strides = [1, 1]} : vector<8x128xf32> to vector<8x32xf32>
    %38 = vector.extract_strided_slice %35 {offsets = [0, 64], sizes = [8, 32], strides = [1, 1]} : vector<8x128xf32> to vector<8x32xf32>
    %39 = vector.extract_strided_slice %35 {offsets = [0, 96], sizes = [8, 32], strides = [1, 1]} : vector<8x128xf32> to vector<8x32xf32>
    %40 = arith.mulf %37, %26 : vector<8x32xf32>
    %41 = arith.mulf %36, %38 : vector<8x32xf32>
    %42 = arith.addf %40, %41 : vector<8x32xf32>
    %43 = math.tanh %42 : vector<8x32xf32>
    %44 = arith.mulf %39, %43 : vector<8x32xf32>
    %45 = arith.truncf %44 : vector<8x32xf32> to vector<8x32xbf16>
    %cst_20 = arith.constant dense<0.000000e+00> : vector<8x128xf32>
    %46 = tpu.matmul %45, %1, %cst_20 {dimension_numbers = #tpu.dot_dimension_numbers<[1], [0], [0], [1], [0, 0, 1, 1], [], []>} : vector<8x32xbf16>, vector<32x128xbf16>, vector<8x128xf32> -> vector<8x128xf32>
    %47 = arith.truncf %26 : vector<8x32xf32> to vector<8x32xbf16>
    %cst_21 = arith.constant dense<0.000000e+00> : vector<8x128xf32>
    %48 = tpu.matmul %47, %2, %cst_21 {dimension_numbers = #tpu.dot_dimension_numbers<[1], [0], [0], [1], [0, 0, 1, 1], [], []>} : vector<8x32xbf16>, vector<32x128xbf16>, vector<8x128xf32> -> vector<8x128xf32>
    %49 = arith.addf %46, %48 : vector<8x128xf32>
    %50 = arith.addf %49, %5 : vector<8x128xf32>
    %51 = arith.mulf %50, %22 : vector<8x128xf32>
    %52 = math.tanh %51 : vector<8x128xf32>
    %53 = arith.mulf %52, %22 : vector<8x128xf32>
    %54 = arith.addf %53, %25 : vector<8x128xf32>
    %55 = vector.extract_strided_slice %54 {offsets = [0, 0], sizes = [8, 32], strides = [1, 1]} : vector<8x128xf32> to vector<8x32xf32>
    %56 = vector.extract_strided_slice %54 {offsets = [0, 32], sizes = [8, 32], strides = [1, 1]} : vector<8x128xf32> to vector<8x32xf32>
    %57 = vector.extract_strided_slice %54 {offsets = [0, 64], sizes = [8, 32], strides = [1, 1]} : vector<8x128xf32> to vector<8x32xf32>
    %58 = vector.extract_strided_slice %54 {offsets = [0, 96], sizes = [8, 32], strides = [1, 1]} : vector<8x128xf32> to vector<8x32xf32>
    %59 = arith.mulf %56, %26 : vector<8x32xf32>
    %60 = arith.mulf %55, %57 : vector<8x32xf32>
    %61 = arith.addf %59, %60 : vector<8x32xf32>
    %62 = math.tanh %61 : vector<8x32xf32>
    %63 = arith.mulf %58, %62 : vector<8x32xf32>
    %64 = vector.extract_strided_slice %13 {offsets = [1, 0, 0], sizes = [1, 8, 128], strides = [1, 1, 1]} : vector<8x8x128xf32> to vector<1x8x128xf32>
    %65 = vector.shape_cast %64 : vector<1x8x128xf32> to vector<8x128xf32>
    %66 = arith.truncf %44 : vector<8x32xf32> to vector<8x32xbf16>
    %cst_22 = arith.constant dense<0.000000e+00> : vector<8x128xf32>
    %67 = tpu.matmul %66, %0, %cst_22 {dimension_numbers = #tpu.dot_dimension_numbers<[1], [0], [0], [1], [0, 0, 1, 1], [], []>} : vector<8x32xbf16>, vector<32x128xbf16>, vector<8x128xf32> -> vector<8x128xf32>
    %68 = arith.addf %65, %67 : vector<8x128xf32>
    %69 = arith.mulf %68, %22 : vector<8x128xf32>
    %70 = math.tanh %69 : vector<8x128xf32>
    %71 = arith.mulf %70, %22 : vector<8x128xf32>
    %72 = arith.addf %71, %25 : vector<8x128xf32>
    %73 = vector.extract_strided_slice %72 {offsets = [0, 0], sizes = [8, 32], strides = [1, 1]} : vector<8x128xf32> to vector<8x32xf32>
    %74 = vector.extract_strided_slice %72 {offsets = [0, 32], sizes = [8, 32], strides = [1, 1]} : vector<8x128xf32> to vector<8x32xf32>
    %75 = vector.extract_strided_slice %72 {offsets = [0, 64], sizes = [8, 32], strides = [1, 1]} : vector<8x128xf32> to vector<8x32xf32>
    %76 = vector.extract_strided_slice %72 {offsets = [0, 96], sizes = [8, 32], strides = [1, 1]} : vector<8x128xf32> to vector<8x32xf32>
    %77 = arith.mulf %74, %42 : vector<8x32xf32>
    %78 = arith.mulf %73, %75 : vector<8x32xf32>
    %79 = arith.addf %77, %78 : vector<8x32xf32>
    %80 = math.tanh %79 : vector<8x32xf32>
    %81 = arith.mulf %76, %80 : vector<8x32xf32>
    %82 = arith.truncf %81 : vector<8x32xf32> to vector<8x32xbf16>
    %cst_23 = arith.constant dense<0.000000e+00> : vector<8x128xf32>
    %83 = tpu.matmul %82, %1, %cst_23 {dimension_numbers = #tpu.dot_dimension_numbers<[1], [0], [0], [1], [0, 0, 1, 1], [], []>} : vector<8x32xbf16>, vector<32x128xbf16>, vector<8x128xf32> -> vector<8x128xf32>
    %84 = arith.truncf %63 : vector<8x32xf32> to vector<8x32xbf16>
    %cst_24 = arith.constant dense<0.000000e+00> : vector<8x128xf32>
    %85 = tpu.matmul %84, %2, %cst_24 {dimension_numbers = #tpu.dot_dimension_numbers<[1], [0], [0], [1], [0, 0, 1, 1], [], []>} : vector<8x32xbf16>, vector<32x128xbf16>, vector<8x128xf32> -> vector<8x128xf32>
    %86 = arith.addf %83, %85 : vector<8x128xf32>
    %87 = arith.addf %86, %5 : vector<8x128xf32>
    %88 = arith.mulf %87, %22 : vector<8x128xf32>
    %89 = math.tanh %88 : vector<8x128xf32>
    %90 = arith.mulf %89, %22 : vector<8x128xf32>
    %91 = arith.addf %90, %25 : vector<8x128xf32>
    %92 = vector.extract_strided_slice %91 {offsets = [0, 0], sizes = [8, 32], strides = [1, 1]} : vector<8x128xf32> to vector<8x32xf32>
    %93 = vector.extract_strided_slice %91 {offsets = [0, 32], sizes = [8, 32], strides = [1, 1]} : vector<8x128xf32> to vector<8x32xf32>
    %94 = vector.extract_strided_slice %91 {offsets = [0, 64], sizes = [8, 32], strides = [1, 1]} : vector<8x128xf32> to vector<8x32xf32>
    %95 = vector.extract_strided_slice %91 {offsets = [0, 96], sizes = [8, 32], strides = [1, 1]} : vector<8x128xf32> to vector<8x32xf32>
    %96 = arith.mulf %93, %61 : vector<8x32xf32>
    %97 = arith.mulf %92, %94 : vector<8x32xf32>
    %98 = arith.addf %96, %97 : vector<8x32xf32>
    %99 = math.tanh %98 : vector<8x32xf32>
    %100 = arith.mulf %95, %99 : vector<8x32xf32>
    %101 = vector.extract_strided_slice %13 {offsets = [2, 0, 0], sizes = [1, 8, 128], strides = [1, 1, 1]} : vector<8x8x128xf32> to vector<1x8x128xf32>
    %102 = vector.shape_cast %101 : vector<1x8x128xf32> to vector<8x128xf32>
    %103 = arith.truncf %81 : vector<8x32xf32> to vector<8x32xbf16>
    %cst_25 = arith.constant dense<0.000000e+00> : vector<8x128xf32>
    %104 = tpu.matmul %103, %0, %cst_25 {dimension_numbers = #tpu.dot_dimension_numbers<[1], [0], [0], [1], [0, 0, 1, 1], [], []>} : vector<8x32xbf16>, vector<32x128xbf16>, vector<8x128xf32> -> vector<8x128xf32>
    %105 = arith.addf %102, %104 : vector<8x128xf32>
    %106 = arith.mulf %105, %22 : vector<8x128xf32>
    %107 = math.tanh %106 : vector<8x128xf32>
    %108 = arith.mulf %107, %22 : vector<8x128xf32>
    %109 = arith.addf %108, %25 : vector<8x128xf32>
    %110 = vector.extract_strided_slice %109 {offsets = [0, 0], sizes = [8, 32], strides = [1, 1]} : vector<8x128xf32> to vector<8x32xf32>
    %111 = vector.extract_strided_slice %109 {offsets = [0, 32], sizes = [8, 32], strides = [1, 1]} : vector<8x128xf32> to vector<8x32xf32>
    %112 = vector.extract_strided_slice %109 {offsets = [0, 64], sizes = [8, 32], strides = [1, 1]} : vector<8x128xf32> to vector<8x32xf32>
    %113 = vector.extract_strided_slice %109 {offsets = [0, 96], sizes = [8, 32], strides = [1, 1]} : vector<8x128xf32> to vector<8x32xf32>
    %114 = arith.mulf %111, %79 : vector<8x32xf32>
    %115 = arith.mulf %110, %112 : vector<8x32xf32>
    %116 = arith.addf %114, %115 : vector<8x32xf32>
    %117 = math.tanh %116 : vector<8x32xf32>
    %118 = arith.mulf %113, %117 : vector<8x32xf32>
    %119 = arith.truncf %118 : vector<8x32xf32> to vector<8x32xbf16>
    %cst_26 = arith.constant dense<0.000000e+00> : vector<8x128xf32>
    %120 = tpu.matmul %119, %1, %cst_26 {dimension_numbers = #tpu.dot_dimension_numbers<[1], [0], [0], [1], [0, 0, 1, 1], [], []>} : vector<8x32xbf16>, vector<32x128xbf16>, vector<8x128xf32> -> vector<8x128xf32>
    %121 = arith.truncf %100 : vector<8x32xf32> to vector<8x32xbf16>
    %cst_27 = arith.constant dense<0.000000e+00> : vector<8x128xf32>
    %122 = tpu.matmul %121, %2, %cst_27 {dimension_numbers = #tpu.dot_dimension_numbers<[1], [0], [0], [1], [0, 0, 1, 1], [], []>} : vector<8x32xbf16>, vector<32x128xbf16>, vector<8x128xf32> -> vector<8x128xf32>
    %123 = arith.addf %120, %122 : vector<8x128xf32>
    %124 = arith.addf %123, %5 : vector<8x128xf32>
    %125 = arith.mulf %124, %22 : vector<8x128xf32>
    %126 = math.tanh %125 : vector<8x128xf32>
    %127 = arith.mulf %126, %22 : vector<8x128xf32>
    %128 = arith.addf %127, %25 : vector<8x128xf32>
    %129 = vector.extract_strided_slice %128 {offsets = [0, 0], sizes = [8, 32], strides = [1, 1]} : vector<8x128xf32> to vector<8x32xf32>
    %130 = vector.extract_strided_slice %128 {offsets = [0, 32], sizes = [8, 32], strides = [1, 1]} : vector<8x128xf32> to vector<8x32xf32>
    %131 = vector.extract_strided_slice %128 {offsets = [0, 64], sizes = [8, 32], strides = [1, 1]} : vector<8x128xf32> to vector<8x32xf32>
    %132 = vector.extract_strided_slice %128 {offsets = [0, 96], sizes = [8, 32], strides = [1, 1]} : vector<8x128xf32> to vector<8x32xf32>
    %133 = arith.mulf %130, %98 : vector<8x32xf32>
    %134 = arith.mulf %129, %131 : vector<8x32xf32>
    %135 = arith.addf %133, %134 : vector<8x32xf32>
    %136 = math.tanh %135 : vector<8x32xf32>
    %137 = arith.mulf %132, %136 : vector<8x32xf32>
    %138 = vector.extract_strided_slice %13 {offsets = [3, 0, 0], sizes = [1, 8, 128], strides = [1, 1, 1]} : vector<8x8x128xf32> to vector<1x8x128xf32>
    %139 = vector.shape_cast %138 : vector<1x8x128xf32> to vector<8x128xf32>
    %140 = arith.truncf %118 : vector<8x32xf32> to vector<8x32xbf16>
    %cst_28 = arith.constant dense<0.000000e+00> : vector<8x128xf32>
    %141 = tpu.matmul %140, %0, %cst_28 {dimension_numbers = #tpu.dot_dimension_numbers<[1], [0], [0], [1], [0, 0, 1, 1], [], []>} : vector<8x32xbf16>, vector<32x128xbf16>, vector<8x128xf32> -> vector<8x128xf32>
    %142 = arith.addf %139, %141 : vector<8x128xf32>
    %143 = arith.mulf %142, %22 : vector<8x128xf32>
    %144 = math.tanh %143 : vector<8x128xf32>
    %145 = arith.mulf %144, %22 : vector<8x128xf32>
    %146 = arith.addf %145, %25 : vector<8x128xf32>
    %147 = vector.extract_strided_slice %146 {offsets = [0, 0], sizes = [8, 32], strides = [1, 1]} : vector<8x128xf32> to vector<8x32xf32>
    %148 = vector.extract_strided_slice %146 {offsets = [0, 32], sizes = [8, 32], strides = [1, 1]} : vector<8x128xf32> to vector<8x32xf32>
    %149 = vector.extract_strided_slice %146 {offsets = [0, 64], sizes = [8, 32], strides = [1, 1]} : vector<8x128xf32> to vector<8x32xf32>
    %150 = vector.extract_strided_slice %146 {offsets = [0, 96], sizes = [8, 32], strides = [1, 1]} : vector<8x128xf32> to vector<8x32xf32>
    %151 = arith.mulf %148, %116 : vector<8x32xf32>
    %152 = arith.mulf %147, %149 : vector<8x32xf32>
    %153 = arith.addf %151, %152 : vector<8x32xf32>
    %154 = math.tanh %153 : vector<8x32xf32>
    %155 = arith.mulf %150, %154 : vector<8x32xf32>
    %156 = arith.truncf %155 : vector<8x32xf32> to vector<8x32xbf16>
    %cst_29 = arith.constant dense<0.000000e+00> : vector<8x128xf32>
    %157 = tpu.matmul %156, %1, %cst_29 {dimension_numbers = #tpu.dot_dimension_numbers<[1], [0], [0], [1], [0, 0, 1, 1], [], []>} : vector<8x32xbf16>, vector<32x128xbf16>, vector<8x128xf32> -> vector<8x128xf32>
    %158 = arith.truncf %137 : vector<8x32xf32> to vector<8x32xbf16>
    %cst_30 = arith.constant dense<0.000000e+00> : vector<8x128xf32>
    %159 = tpu.matmul %158, %2, %cst_30 {dimension_numbers = #tpu.dot_dimension_numbers<[1], [0], [0], [1], [0, 0, 1, 1], [], []>} : vector<8x32xbf16>, vector<32x128xbf16>, vector<8x128xf32> -> vector<8x128xf32>
    %160 = arith.addf %157, %159 : vector<8x128xf32>
    %161 = arith.addf %160, %5 : vector<8x128xf32>
    %162 = arith.mulf %161, %22 : vector<8x128xf32>
    %163 = math.tanh %162 : vector<8x128xf32>
    %164 = arith.mulf %163, %22 : vector<8x128xf32>
    %165 = arith.addf %164, %25 : vector<8x128xf32>
    %166 = vector.extract_strided_slice %165 {offsets = [0, 0], sizes = [8, 32], strides = [1, 1]} : vector<8x128xf32> to vector<8x32xf32>
    %167 = vector.extract_strided_slice %165 {offsets = [0, 32], sizes = [8, 32], strides = [1, 1]} : vector<8x128xf32> to vector<8x32xf32>
    %168 = vector.extract_strided_slice %165 {offsets = [0, 64], sizes = [8, 32], strides = [1, 1]} : vector<8x128xf32> to vector<8x32xf32>
    %169 = vector.extract_strided_slice %165 {offsets = [0, 96], sizes = [8, 32], strides = [1, 1]} : vector<8x128xf32> to vector<8x32xf32>
    %170 = arith.mulf %167, %135 : vector<8x32xf32>
    %171 = arith.mulf %166, %168 : vector<8x32xf32>
    %172 = arith.addf %170, %171 : vector<8x32xf32>
    %173 = math.tanh %172 : vector<8x32xf32>
    %174 = arith.mulf %169, %173 : vector<8x32xf32>
    %175 = vector.extract_strided_slice %13 {offsets = [4, 0, 0], sizes = [1, 8, 128], strides = [1, 1, 1]} : vector<8x8x128xf32> to vector<1x8x128xf32>
    %176 = vector.shape_cast %175 : vector<1x8x128xf32> to vector<8x128xf32>
    %177 = arith.truncf %155 : vector<8x32xf32> to vector<8x32xbf16>
    %cst_31 = arith.constant dense<0.000000e+00> : vector<8x128xf32>
    %178 = tpu.matmul %177, %0, %cst_31 {dimension_numbers = #tpu.dot_dimension_numbers<[1], [0], [0], [1], [0, 0, 1, 1], [], []>} : vector<8x32xbf16>, vector<32x128xbf16>, vector<8x128xf32> -> vector<8x128xf32>
    %179 = arith.addf %176, %178 : vector<8x128xf32>
    %180 = arith.mulf %179, %22 : vector<8x128xf32>
    %181 = math.tanh %180 : vector<8x128xf32>
    %182 = arith.mulf %181, %22 : vector<8x128xf32>
    %183 = arith.addf %182, %25 : vector<8x128xf32>
    %184 = vector.extract_strided_slice %183 {offsets = [0, 0], sizes = [8, 32], strides = [1, 1]} : vector<8x128xf32> to vector<8x32xf32>
    %185 = vector.extract_strided_slice %183 {offsets = [0, 32], sizes = [8, 32], strides = [1, 1]} : vector<8x128xf32> to vector<8x32xf32>
    %186 = vector.extract_strided_slice %183 {offsets = [0, 64], sizes = [8, 32], strides = [1, 1]} : vector<8x128xf32> to vector<8x32xf32>
    %187 = vector.extract_strided_slice %183 {offsets = [0, 96], sizes = [8, 32], strides = [1, 1]} : vector<8x128xf32> to vector<8x32xf32>
    %188 = arith.mulf %185, %153 : vector<8x32xf32>
    %189 = arith.mulf %184, %186 : vector<8x32xf32>
    %190 = arith.addf %188, %189 : vector<8x32xf32>
    %191 = math.tanh %190 : vector<8x32xf32>
    %192 = arith.mulf %187, %191 : vector<8x32xf32>
    %193 = arith.truncf %192 : vector<8x32xf32> to vector<8x32xbf16>
    %cst_32 = arith.constant dense<0.000000e+00> : vector<8x128xf32>
    %194 = tpu.matmul %193, %1, %cst_32 {dimension_numbers = #tpu.dot_dimension_numbers<[1], [0], [0], [1], [0, 0, 1, 1], [], []>} : vector<8x32xbf16>, vector<32x128xbf16>, vector<8x128xf32> -> vector<8x128xf32>
    %195 = arith.truncf %174 : vector<8x32xf32> to vector<8x32xbf16>
    %cst_33 = arith.constant dense<0.000000e+00> : vector<8x128xf32>
    %196 = tpu.matmul %195, %2, %cst_33 {dimension_numbers = #tpu.dot_dimension_numbers<[1], [0], [0], [1], [0, 0, 1, 1], [], []>} : vector<8x32xbf16>, vector<32x128xbf16>, vector<8x128xf32> -> vector<8x128xf32>
    %197 = arith.addf %194, %196 : vector<8x128xf32>
    %198 = arith.addf %197, %5 : vector<8x128xf32>
    %199 = arith.mulf %198, %22 : vector<8x128xf32>
    %200 = math.tanh %199 : vector<8x128xf32>
    %201 = arith.mulf %200, %22 : vector<8x128xf32>
    %202 = arith.addf %201, %25 : vector<8x128xf32>
    %203 = vector.extract_strided_slice %202 {offsets = [0, 0], sizes = [8, 32], strides = [1, 1]} : vector<8x128xf32> to vector<8x32xf32>
    %204 = vector.extract_strided_slice %202 {offsets = [0, 32], sizes = [8, 32], strides = [1, 1]} : vector<8x128xf32> to vector<8x32xf32>
    %205 = vector.extract_strided_slice %202 {offsets = [0, 64], sizes = [8, 32], strides = [1, 1]} : vector<8x128xf32> to vector<8x32xf32>
    %206 = vector.extract_strided_slice %202 {offsets = [0, 96], sizes = [8, 32], strides = [1, 1]} : vector<8x128xf32> to vector<8x32xf32>
    %207 = arith.mulf %204, %172 : vector<8x32xf32>
    %208 = arith.mulf %203, %205 : vector<8x32xf32>
    %209 = arith.addf %207, %208 : vector<8x32xf32>
    %210 = math.tanh %209 : vector<8x32xf32>
    %211 = arith.mulf %206, %210 : vector<8x32xf32>
    %212 = vector.extract_strided_slice %13 {offsets = [5, 0, 0], sizes = [1, 8, 128], strides = [1, 1, 1]} : vector<8x8x128xf32> to vector<1x8x128xf32>
    %213 = vector.shape_cast %212 : vector<1x8x128xf32> to vector<8x128xf32>
    %214 = arith.truncf %192 : vector<8x32xf32> to vector<8x32xbf16>
    %cst_34 = arith.constant dense<0.000000e+00> : vector<8x128xf32>
    %215 = tpu.matmul %214, %0, %cst_34 {dimension_numbers = #tpu.dot_dimension_numbers<[1], [0], [0], [1], [0, 0, 1, 1], [], []>} : vector<8x32xbf16>, vector<32x128xbf16>, vector<8x128xf32> -> vector<8x128xf32>
    %216 = arith.addf %213, %215 : vector<8x128xf32>
    %217 = arith.mulf %216, %22 : vector<8x128xf32>
    %218 = math.tanh %217 : vector<8x128xf32>
    %219 = arith.mulf %218, %22 : vector<8x128xf32>
    %220 = arith.addf %219, %25 : vector<8x128xf32>
    %221 = vector.extract_strided_slice %220 {offsets = [0, 0], sizes = [8, 32], strides = [1, 1]} : vector<8x128xf32> to vector<8x32xf32>
    %222 = vector.extract_strided_slice %220 {offsets = [0, 32], sizes = [8, 32], strides = [1, 1]} : vector<8x128xf32> to vector<8x32xf32>
    %223 = vector.extract_strided_slice %220 {offsets = [0, 64], sizes = [8, 32], strides = [1, 1]} : vector<8x128xf32> to vector<8x32xf32>
    %224 = vector.extract_strided_slice %220 {offsets = [0, 96], sizes = [8, 32], strides = [1, 1]} : vector<8x128xf32> to vector<8x32xf32>
    %225 = arith.mulf %222, %190 : vector<8x32xf32>
    %226 = arith.mulf %221, %223 : vector<8x32xf32>
    %227 = arith.addf %225, %226 : vector<8x32xf32>
    %228 = math.tanh %227 : vector<8x32xf32>
    %229 = arith.mulf %224, %228 : vector<8x32xf32>
    %230 = arith.truncf %229 : vector<8x32xf32> to vector<8x32xbf16>
    %cst_35 = arith.constant dense<0.000000e+00> : vector<8x128xf32>
    %231 = tpu.matmul %230, %1, %cst_35 {dimension_numbers = #tpu.dot_dimension_numbers<[1], [0], [0], [1], [0, 0, 1, 1], [], []>} : vector<8x32xbf16>, vector<32x128xbf16>, vector<8x128xf32> -> vector<8x128xf32>
    %232 = arith.truncf %211 : vector<8x32xf32> to vector<8x32xbf16>
    %cst_36 = arith.constant dense<0.000000e+00> : vector<8x128xf32>
    %233 = tpu.matmul %232, %2, %cst_36 {dimension_numbers = #tpu.dot_dimension_numbers<[1], [0], [0], [1], [0, 0, 1, 1], [], []>} : vector<8x32xbf16>, vector<32x128xbf16>, vector<8x128xf32> -> vector<8x128xf32>
    %234 = arith.addf %231, %233 : vector<8x128xf32>
    %235 = arith.addf %234, %5 : vector<8x128xf32>
    %236 = arith.mulf %235, %22 : vector<8x128xf32>
    %237 = math.tanh %236 : vector<8x128xf32>
    %238 = arith.mulf %237, %22 : vector<8x128xf32>
    %239 = arith.addf %238, %25 : vector<8x128xf32>
    %240 = vector.extract_strided_slice %239 {offsets = [0, 0], sizes = [8, 32], strides = [1, 1]} : vector<8x128xf32> to vector<8x32xf32>
    %241 = vector.extract_strided_slice %239 {offsets = [0, 32], sizes = [8, 32], strides = [1, 1]} : vector<8x128xf32> to vector<8x32xf32>
    %242 = vector.extract_strided_slice %239 {offsets = [0, 64], sizes = [8, 32], strides = [1, 1]} : vector<8x128xf32> to vector<8x32xf32>
    %243 = vector.extract_strided_slice %239 {offsets = [0, 96], sizes = [8, 32], strides = [1, 1]} : vector<8x128xf32> to vector<8x32xf32>
    %244 = arith.mulf %241, %209 : vector<8x32xf32>
    %245 = arith.mulf %240, %242 : vector<8x32xf32>
    %246 = arith.addf %244, %245 : vector<8x32xf32>
    %247 = math.tanh %246 : vector<8x32xf32>
    %248 = arith.mulf %243, %247 : vector<8x32xf32>
    %249 = vector.extract_strided_slice %13 {offsets = [6, 0, 0], sizes = [1, 8, 128], strides = [1, 1, 1]} : vector<8x8x128xf32> to vector<1x8x128xf32>
    %250 = vector.shape_cast %249 : vector<1x8x128xf32> to vector<8x128xf32>
    %251 = arith.truncf %229 : vector<8x32xf32> to vector<8x32xbf16>
    %cst_37 = arith.constant dense<0.000000e+00> : vector<8x128xf32>
    %252 = tpu.matmul %251, %0, %cst_37 {dimension_numbers = #tpu.dot_dimension_numbers<[1], [0], [0], [1], [0, 0, 1, 1], [], []>} : vector<8x32xbf16>, vector<32x128xbf16>, vector<8x128xf32> -> vector<8x128xf32>
    %253 = arith.addf %250, %252 : vector<8x128xf32>
    %254 = arith.mulf %253, %22 : vector<8x128xf32>
    %255 = math.tanh %254 : vector<8x128xf32>
    %256 = arith.mulf %255, %22 : vector<8x128xf32>
    %257 = arith.addf %256, %25 : vector<8x128xf32>
    %258 = vector.extract_strided_slice %257 {offsets = [0, 0], sizes = [8, 32], strides = [1, 1]} : vector<8x128xf32> to vector<8x32xf32>
    %259 = vector.extract_strided_slice %257 {offsets = [0, 32], sizes = [8, 32], strides = [1, 1]} : vector<8x128xf32> to vector<8x32xf32>
    %260 = vector.extract_strided_slice %257 {offsets = [0, 64], sizes = [8, 32], strides = [1, 1]} : vector<8x128xf32> to vector<8x32xf32>
    %261 = vector.extract_strided_slice %257 {offsets = [0, 96], sizes = [8, 32], strides = [1, 1]} : vector<8x128xf32> to vector<8x32xf32>
    %262 = arith.mulf %259, %227 : vector<8x32xf32>
    %263 = arith.mulf %258, %260 : vector<8x32xf32>
    %264 = arith.addf %262, %263 : vector<8x32xf32>
    %265 = math.tanh %264 : vector<8x32xf32>
    %266 = arith.mulf %261, %265 : vector<8x32xf32>
    %267 = arith.truncf %266 : vector<8x32xf32> to vector<8x32xbf16>
    %cst_38 = arith.constant dense<0.000000e+00> : vector<8x128xf32>
    %268 = tpu.matmul %267, %1, %cst_38 {dimension_numbers = #tpu.dot_dimension_numbers<[1], [0], [0], [1], [0, 0, 1, 1], [], []>} : vector<8x32xbf16>, vector<32x128xbf16>, vector<8x128xf32> -> vector<8x128xf32>
    %269 = arith.truncf %248 : vector<8x32xf32> to vector<8x32xbf16>
    %cst_39 = arith.constant dense<0.000000e+00> : vector<8x128xf32>
    %270 = tpu.matmul %269, %2, %cst_39 {dimension_numbers = #tpu.dot_dimension_numbers<[1], [0], [0], [1], [0, 0, 1, 1], [], []>} : vector<8x32xbf16>, vector<32x128xbf16>, vector<8x128xf32> -> vector<8x128xf32>
    %271 = arith.addf %268, %270 : vector<8x128xf32>
    %272 = arith.addf %271, %5 : vector<8x128xf32>
    %273 = arith.mulf %272, %22 : vector<8x128xf32>
    %274 = math.tanh %273 : vector<8x128xf32>
    %275 = arith.mulf %274, %22 : vector<8x128xf32>
    %276 = arith.addf %275, %25 : vector<8x128xf32>
    %277 = vector.extract_strided_slice %276 {offsets = [0, 0], sizes = [8, 32], strides = [1, 1]} : vector<8x128xf32> to vector<8x32xf32>
    %278 = vector.extract_strided_slice %276 {offsets = [0, 32], sizes = [8, 32], strides = [1, 1]} : vector<8x128xf32> to vector<8x32xf32>
    %279 = vector.extract_strided_slice %276 {offsets = [0, 64], sizes = [8, 32], strides = [1, 1]} : vector<8x128xf32> to vector<8x32xf32>
    %280 = vector.extract_strided_slice %276 {offsets = [0, 96], sizes = [8, 32], strides = [1, 1]} : vector<8x128xf32> to vector<8x32xf32>
    %281 = arith.mulf %278, %246 : vector<8x32xf32>
    %282 = arith.mulf %277, %279 : vector<8x32xf32>
    %283 = arith.addf %281, %282 : vector<8x32xf32>
    %284 = math.tanh %283 : vector<8x32xf32>
    %285 = arith.mulf %280, %284 : vector<8x32xf32>
    %286 = vector.extract_strided_slice %13 {offsets = [7, 0, 0], sizes = [1, 8, 128], strides = [1, 1, 1]} : vector<8x8x128xf32> to vector<1x8x128xf32>
    %287 = vector.shape_cast %286 : vector<1x8x128xf32> to vector<8x128xf32>
    %288 = arith.truncf %266 : vector<8x32xf32> to vector<8x32xbf16>
    %cst_40 = arith.constant dense<0.000000e+00> : vector<8x128xf32>
    %289 = tpu.matmul %288, %0, %cst_40 {dimension_numbers = #tpu.dot_dimension_numbers<[1], [0], [0], [1], [0, 0, 1, 1], [], []>} : vector<8x32xbf16>, vector<32x128xbf16>, vector<8x128xf32> -> vector<8x128xf32>
    %290 = arith.addf %287, %289 : vector<8x128xf32>
    %291 = arith.mulf %290, %22 : vector<8x128xf32>
    %292 = math.tanh %291 : vector<8x128xf32>
    %293 = arith.mulf %292, %22 : vector<8x128xf32>
    %294 = arith.addf %293, %25 : vector<8x128xf32>
    %295 = vector.extract_strided_slice %294 {offsets = [0, 0], sizes = [8, 32], strides = [1, 1]} : vector<8x128xf32> to vector<8x32xf32>
    %296 = vector.extract_strided_slice %294 {offsets = [0, 32], sizes = [8, 32], strides = [1, 1]} : vector<8x128xf32> to vector<8x32xf32>
    %297 = vector.extract_strided_slice %294 {offsets = [0, 64], sizes = [8, 32], strides = [1, 1]} : vector<8x128xf32> to vector<8x32xf32>
    %298 = vector.extract_strided_slice %294 {offsets = [0, 96], sizes = [8, 32], strides = [1, 1]} : vector<8x128xf32> to vector<8x32xf32>
    %299 = arith.mulf %296, %264 : vector<8x32xf32>
    %300 = arith.mulf %295, %297 : vector<8x32xf32>
    %301 = arith.addf %299, %300 : vector<8x32xf32>
    %302 = math.tanh %301 : vector<8x32xf32>
    %303 = arith.mulf %298, %302 : vector<8x32xf32>
    %304 = arith.truncf %303 : vector<8x32xf32> to vector<8x32xbf16>
    %cst_41 = arith.constant dense<0.000000e+00> : vector<8x128xf32>
    %305 = tpu.matmul %304, %1, %cst_41 {dimension_numbers = #tpu.dot_dimension_numbers<[1], [0], [0], [1], [0, 0, 1, 1], [], []>} : vector<8x32xbf16>, vector<32x128xbf16>, vector<8x128xf32> -> vector<8x128xf32>
    %306 = arith.truncf %285 : vector<8x32xf32> to vector<8x32xbf16>
    %cst_42 = arith.constant dense<0.000000e+00> : vector<8x128xf32>
    %307 = tpu.matmul %306, %2, %cst_42 {dimension_numbers = #tpu.dot_dimension_numbers<[1], [0], [0], [1], [0, 0, 1, 1], [], []>} : vector<8x32xbf16>, vector<32x128xbf16>, vector<8x128xf32> -> vector<8x128xf32>
    %308 = arith.addf %305, %307 : vector<8x128xf32>
    %309 = arith.addf %308, %5 : vector<8x128xf32>
    %310 = arith.mulf %309, %22 : vector<8x128xf32>
    %311 = math.tanh %310 : vector<8x128xf32>
    %312 = arith.mulf %311, %22 : vector<8x128xf32>
    %313 = arith.addf %312, %25 : vector<8x128xf32>
    %314 = vector.extract_strided_slice %313 {offsets = [0, 0], sizes = [8, 32], strides = [1, 1]} : vector<8x128xf32> to vector<8x32xf32>
    %315 = vector.extract_strided_slice %313 {offsets = [0, 32], sizes = [8, 32], strides = [1, 1]} : vector<8x128xf32> to vector<8x32xf32>
    %316 = vector.extract_strided_slice %313 {offsets = [0, 64], sizes = [8, 32], strides = [1, 1]} : vector<8x128xf32> to vector<8x32xf32>
    %317 = vector.extract_strided_slice %313 {offsets = [0, 96], sizes = [8, 32], strides = [1, 1]} : vector<8x128xf32> to vector<8x32xf32>
    %318 = arith.mulf %315, %283 : vector<8x32xf32>
    %319 = arith.mulf %314, %316 : vector<8x32xf32>
    %320 = arith.addf %318, %319 : vector<8x32xf32>
    %321 = math.tanh %320 : vector<8x32xf32>
    %322 = arith.mulf %317, %321 : vector<8x32xf32>
    %323 = arith.truncf %322 : vector<8x32xf32> to vector<8x32xbf16>
    %c0_43 = arith.constant 0 : index
    %c0_44 = arith.constant 0 : index
    %324 = vector.load %arg7[%c0_43, %c0_44] : memref<32x2xbf16, #tpu.memory_space<vmem>>, vector<32x2xbf16>
    %cst_45 = arith.constant dense<0.000000e+00> : vector<8x2xf32>
    %325 = tpu.matmul %323, %324, %cst_45 {dimension_numbers = #tpu.dot_dimension_numbers<[1], [0], [0], [1], [0, 0, 1, 1], [], []>} : vector<8x32xbf16>, vector<32x2xbf16>, vector<8x2xf32> -> vector<8x2xf32>
    %c0_46 = arith.constant 0 : index
    %c0_47 = arith.constant 0 : index
    %326 = vector.load %arg8[%c0_46, %c0_47] : memref<1x2xf32, #tpu.memory_space<vmem>>, vector<1x2xf32>
    %327 = vector.broadcast %326 : vector<1x2xf32> to vector<8x2xf32>
    %328 = arith.addf %325, %327 : vector<8x2xf32>
    %c0_48 = arith.constant 0 : index
    %c0_49 = arith.constant 0 : index
    %329 = vector.load %arg9[%c0_48, %c0_49] : memref<8x2xf32, #tpu.memory_space<vmem>>, vector<8x2xf32>
    tpu.vector_store %arg9[%c0_48, %c0_49], %328 {strides = array<i32>} : memref<8x2xf32, #tpu.memory_space<vmem>>, vector<8x2xf32>,
    return
  }
}

</mosaic_0001>

<bundles_post_ra>
// kernel: tpu_custom_call.1
= control target key start
LH: loop header
LB: loop body
LE: loop exit
PB: predicated region body
PF: predicated region fallthrough
CT: control target
= control target key end

     0   :  { %14 = vsyncpa [#allocation3], 0  ;;  %s2851_s0 = inlined_call_operand.hbm [shape: bf16[8,8,32], index: 0, kind: input, shape index: {}]   ;;  %s2852_s1 = inlined_call_operand.vmem [shape: bf16[32,128], index: 1, kind: input, shape index: {}]   ;;  %s2853_s2 = inlined_call_operand.hbm [shape: bf16[32,128], index: 2, kind: input, shape index: {}]   ;;  %s2854_s3 = inlined_call_operand.hbm [shape: f32[1,128], index: 3, kind: input, shape index: {}]   ;;  %s2855_s4 = inlined_call_operand.vmem [shape: bf16[32,128], index: 4, kind: input, shape index: {}]   ;;  %s2856_s5 = inlined_call_operand.hbm [shape: bf16[32,128], index: 5, kind: input, shape index: {}]   ;;  %s2857_s6 = inlined_call_operand.vmem [shape: f32[1,128], index: 6, kind: input, shape index: {}]   ;;  %s2858_s7 = inlined_call_operand.vmem [shape: bf16[32,2], index: 7, kind: input, shape index: {}]   ;;  %s2859_s8 = inlined_call_operand.vmem [shape: f32[1,2], index: 8, kind: input, shape index: {}]   ;;  %s2860_s9 = inlined_call_operand.vmem [shape: f32[8,2], index: 9, kind: output, shape index: {}]  }
   0x1   :  { %15 = vsyncpa [#allocation5], 0 }
   0x2   :  { %16 = vsyncpa [#allocation8], 0  ;;  %s2299_s30 = smov [#allocation4]   ;;  %s2300_s11 = smov [#allocation2]  }
   0x3   :  { %s36_s10 = sshll.u32 %s2299_s30, 4  ;;  %s22_s12 = sshll.u32 %s2300_s11, 4  ;;  %s37_s10 = int_to_ptr.vmem [resolvable:$true] %s36_s10  ;;  %s2360_s12 = int_to_ptr.vmem [resolvable:$true] %s22_s12 }
   0x4   :  { %s2205_s15 = scalar_lea.hbm %s2853_s2, 256 }
   0x5   :  { %p2206_p0 = scmp.ne.s32.totalorder %s2853_s2, %s2205_s15  ;;  %p2209_p1 = scmp.lt.u32.totalorder %s2205_s15, %s2853_s2 }
   0x7   :  { %p2211_p2 = pnand %p2209_p1, %p2206_p0 }
   0x9   :  { %2214 = shalt.err (!%p2211_p2)
}
   0xa   :  { %s2215_s20 = scalar_lea.vmem %s37_s10, 256  ;;  %p2220_p4 = scmp.lt.s32.totalorder %s37_s10, %s37_s10 }
   0xb   :  { %p2216_p3 = scmp.ne.s32.totalorder %s37_s10, %s2215_s20  ;;  %p2221_p5 = scmp.lt.s32.totalorder %s2215_s20, %s2215_s20 }
   0xd   :  { %p2222_p6 = por %p2221_p5, %p2220_p4 }
   0xf   :  { %p2223_p7 = pnand %p2222_p6, %p2216_p3 }
  0x11   :  { %2226 = shalt.err (!%p2223_p7)
}
  0x12   :  { %s2301_s21 = smov 64   ;;  %s2302_s22 = smov 4  }
  0x13   :  { %42 = dma.hbm_to_vmem [thread:$0]  %s2853_s2, 256, %s37_s10, [#allocation5], %s2301_s21, %s2301_s21, %s2302_s22  }
  0x14   :  { %s2227_s27 = scalar_lea.hbm %s2851_s0, 512 }
  0x15   :  { %p2228_p8 = scmp.ne.s32.totalorder %s2851_s0, %s2227_s27  ;;  %p2231_p9 = scmp.lt.u32.totalorder %s2227_s27, %s2851_s0 }
  0x17   :  { %p2233_p10 = pnand %p2231_p9, %p2228_p8 }
  0x19   :  { %2236 = shalt.err (!%p2233_p10)
}
  0x1a   :  { %s2237_s13 = scalar_lea.vmem %s2360_s12, 512  ;;  %p2242_p12 = scmp.lt.s32.totalorder %s2360_s12, %s2360_s12 }
  0x1b   :  { %p2238_p11 = scmp.ne.s32.totalorder %s2360_s12, %s2237_s13  ;;  %p2243_p13 = scmp.lt.s32.totalorder %s2237_s13, %s2237_s13 }
  0x1d   :  { %p2244_p0 = por %p2243_p13, %p2242_p12 }
  0x1f   :  { %p2245_p1 = pnand %p2244_p0, %p2238_p11 }
  0x21   :  { %2248 = shalt.err (!%p2245_p1)
}
  0x22   :  { %28 = dma.hbm_to_vmem [thread:$0]  %s2851_s0, 512, %s2360_s12, [#allocation3], %s2301_s21, %s2301_s21, %s2302_s22  }
  0x23   :  { %s2303_s14 = smov [#allocation6]   ;;  %s2304_s16 = smov [#allocation7]  }
  0x24   :  { %s49_s15 = sshll.u32 %s2303_s14, 4  ;;  %s60_s17 = sshll.u32 %s2304_s16, 4  ;;  %s50_s15 = int_to_ptr.vmem [resolvable:$true] %s49_s15  ;;  %s2397_s17 = int_to_ptr.vmem [resolvable:$true] %s60_s17 }
  0x25   :  { %s2249_s20 = scalar_lea.hbm %s2854_s3, 16 }
  0x26   :  { %p2250_p2 = scmp.ne.s32.totalorder %s2854_s3, %s2249_s20  ;;  %p2253_p3 = scmp.lt.u32.totalorder %s2249_s20, %s2854_s3 }
  0x28   :  { %p2255_p4 = pnand %p2253_p3, %p2250_p2 }
  0x2a   :  { %2258 = shalt.err (!%p2255_p4)
}
  0x2b   :  { %s2259_s0 = scalar_lea.vmem %s50_s15, 16  ;;  %s2263_s12 = scalar_lea.vmem %s50_s15, 32 }
  0x2c   :  { %p2260_p5 = scmp.ne.s32.totalorder %s50_s15, %s2259_s0  ;;  %p2264_p6 = scmp.lt.s32.totalorder %s50_s15, %s50_s15 }
  0x2d   :  { %p2265_p7 = scmp.lt.s32.totalorder %s2263_s12, %s2259_s0 }
  0x2f   :  { %p2266_p8 = por %p2265_p7, %p2264_p6 }
  0x31   :  { %p2267_p9 = pnand %p2266_p8, %p2260_p5 }
  0x33   :  { %2270 = shalt.err (!%p2267_p9)
}
  0x34   :  { %52 = dma.hbm_to_vmem [thread:$0]  %s2854_s3, 16, %s50_s15, [#allocation5]  }
  0x35   :  { %s2271_s11 = scalar_lea.hbm %s2856_s5, 256 }
  0x36   :  { %p2272_p10 = scmp.ne.s32.totalorder %s2856_s5, %s2271_s11  ;;  %p2275_p11 = scmp.lt.u32.totalorder %s2271_s11, %s2856_s5 }
  0x38   :  { %p2277_p12 = pnand %p2275_p11, %p2272_p10 }
  0x3a   :  { %2280 = shalt.err (!%p2277_p12)
}
  0x3b   :  { %s2281_s16 = scalar_lea.vmem %s2397_s17, 256  ;;  %p2286_p0 = scmp.lt.s32.totalorder %s2397_s17, %s2397_s17 }
  0x3c   :  { %p2282_p13 = scmp.ne.s32.totalorder %s2397_s17, %s2281_s16  ;;  %p2287_p1 = scmp.lt.s32.totalorder %s2281_s16, %s2281_s16 }
  0x3e   :  { %p2288_p2 = por %p2287_p1, %p2286_p0 }
  0x40   :  { %p2289_p3 = pnand %p2288_p2, %p2282_p13 }
  0x42   :  { %2292 = shalt.err (!%p2289_p3)
}
  0x43   :  { %66 = dma.hbm_to_vmem [thread:$0]  %s2856_s5, 256, %s2397_s17, [#allocation8], %s2301_s21, %s2301_s21, %s2302_s22  }
  0x44   :  { %2293 = dma.done.wait [#allocation3], 512  }
  0x45   :  { %2294 = vsyncadd [#allocation3], 4294966784 }
  0x46   :  { %2295 = dma.done.wait [#allocation5], 272  }
  0x47   :  { %2296 = vsyncadd [#allocation5], 4294967024 }
  0x48   :  { %2297 = dma.done.wait [#allocation8], 256  }
  0x49   :  { %2298 = vsyncadd [#allocation8], 4294967040  ;;  %v2305_v0 = vmov 0.0   ;;  %vm2306_vm0 = vmmov 0   ;;  %v2124_v1 = vld [vmem:[%s2852_s1] sm:$0xff]   ;;  %v2126_v3 = vld [vmem:[%s2852_s1 + $0x8] sm:$0xff]   ;;  %v234_v8 = vlaneseq }
  0x4a   :  { %1913 = vmatprep.subr.bf16.mxu1 %v2305_v0  ;;  %1917 = vmatprep.mubr.msk.bf16.mxu1 %vm2306_vm0, %v2305_v0  ;;  %v2437_v2 = vld [vmem:[#allocation4] sm:$0xff]   ;;  %v2443_v4 = vld [vmem:[#allocation4 + $0x8] sm:$0xff]   ;;  %vm156_vm1 = vcmask 261120   ;;  %v2307_v7 = vmov 0   ;;  %v2453_v10 = vld [vmem:[#allocation6] ss:$0 sm:$0xff] }
  0x4b   :  { %1901 = vmatprep.subr.bf16.mxu0 %v2124_v1  ;;  %1914 = vmatpush3.bf16.msra.mxu1 %v2437_v2  ;;  %v2128_v5 = vld [vmem:[#allocation2] sm:$0xff]   ;;  %v2129_v6 = vld [vmem:[#allocation2 + $0x8] sm:$0xff]   ;;  %v235_v9 = vand.u32 127, %v234_v8  ;;  %v2308_v18 = vmov 0.5   ;;  %s2309_s1 = smov 32   ;;  %v2474_v33 = vld [vmem:[#allocation7] sm:$0xff]  }
  0x4c   :  { %1902 = vmatpush3.bf16.msra.mxu0 %v2124_v1  ;;  %1915 = vmatprep.subr.bf16.mxu1 %v2305_v0  ;;  %v2479_v34 = vld [vmem:[%s2855_s4] sm:$0xff]   ;;  %v2132_v35 = vld [vmem:[#allocation2 + $0x10] sm:$0xff]   ;;  %v2134_v36 = vld [vmem:[#allocation2 + $0x18] sm:$0xff]   ;;  %vm1767_vm5 = vcmask 15360  }
  0x4d   :  { %1903 = vmatprep.subr.bf16.mxu0 %v2126_v3  ;;  %1905 = vmatprep.mubr.msk.bf16.mxu0 %vm156_vm1, %v2128_v5  ;;  %vm236_vm2 = vcmp.ge.s32.totalorder %v235_v9, 64  ;;  %vm237_vm3 = vcmp.lt.s32.totalorder %v235_v9, 96  ;;  %v2483_v37 = vld [vmem:[#allocation7 + $0x8] sm:$0xff]   ;;  %v2488_v38 = vld [vmem:[%s2855_s4 + $0x8] sm:$0xff]  }
  0x4e   :  { %vm238_vm4 = vmand %vm236_vm2, %vm237_vm3  ;;  %v2535_v53 = vld [vmem:[%s2857_s6] ss:$0 sm:$0xff] }
  0x4f   :  { %1916 = vmatpush3.bf16.msra.mxu1 %v2443_v4  ;;  %v2460_v19 = vsel %vm238_vm4, 1.0, %v2308_v18  ;;  %v2465_v25 = vsel %vm238_vm4, 0.0, %v2308_v18 }
  0x50   :  { %1904 = vmatpush3.bf16.msra.mxu0 %v2126_v3  ;;  %1921 = vmatprep.subr.bf16.mxu1 %v2305_v0 }
  0x51   :  { %1929 = vmatprep.subr.bf16.mxu0 %v2305_v0 }
  0x52   :  { %1918 = vmatmul.mubr.bf16.vlgmr.msra.gmra.mrb[0].mxu1 %v2307_v7 }
  0x53   :  { %1906 = vmatmul.mubr.msk.bf16.vlgmr.msra.gmra.mrb[0].mxu0 %vm156_vm1, %v2129_v6  ;;  %1925 = vmatprep.mubr.msk.bf16.mxu1 %vm2306_vm0, %v2305_v0 }
  0x54   :  { %1922 = vmatpush3.bf16.msra.mxu1 %v2474_v33  ;;  %1930 = vmatpush3.bf16.msra.mxu0 %v2479_v34 }
  0x55   :  { %1923 = vmatprep.subr.bf16.mxu1 %v2305_v0  ;;  %1909 = vmatprep.mubr.msk.bf16.mxu0 %vm156_vm1, %v2132_v35 }
  0x56   :  { %1931 = vmatprep.subr.bf16.mxu0 %v2305_v0 }
  0x58   :  { %1924 = vmatpush3.bf16.msra.mxu1 %v2483_v37  ;;  %1932 = vmatpush3.bf16.msra.mxu0 %v2488_v38 }
  0x59   :  { %1937 = vmatprep.subr.bf16.mxu1 %v2305_v0  ;;  %1945 = vmatprep.subr.bf16.mxu0 %v2305_v0 }
  0x5b   :  { %1910 = vmatmul.mubr.msk.bf16.gmra.mrb[4].mxu0 %vm156_vm1, %v2134_v36  ;;  %1926 = vmatmul.mubr.bf16.vlgmr.msra.gmra.mrb[4].mxu1 %v2307_v7 }
  0x5c   :  { %1933 = vmatprep.mubr.msk.bf16.mxu0 %vm2306_vm0, %v2305_v0  ;;  %1938 = vmatpush3.bf16.msra.mxu1 %v2437_v2 }
  0x5d   :  { %1941 = vmatprep.mubr.msk.bf16.mxu1 %vm2306_vm0, %v2305_v0  ;;  %1939 = vmatprep.subr.bf16.mxu1 %v2305_v0 }
  0x60   :  { %1940 = vmatpush3.bf16.msra.mxu1 %v2443_v4 }
  0x61   :  { %1953 = vmatprep.subr.bf16.mxu1 %v2305_v0 }
 0x125   :  { %v290_v12 = vpop.f32.mrb[0].mxu1 }
 0x126   :  { %v2455_v11 = vpop.f32.mrb[0].mxu0  ;;  %v1919_v14 = vpop.f32.mrb[1].mxu1 }
 0x127   :  { %v203_v13 = vpop.f32.mrb[1].mxu0  ;;  %v293_v17 = vpop.f32.mrb[2].mxu1 }
 0x128   :  { %v204_v15 = vadd.f32 %v2453_v10, %v203_v13  ;;  %v2458_v16 = vpop.f32.mrb[2].mxu0  ;;  %v1920_v21 = vpop.f32.mrb[3].mxu1 }
 0x129   :  { %v2462_v20 = vpop.f32.mrb[3].mxu0 }
 0x12a   :  { %v296_v22 = vadd.f32 %v290_v12, %v204_v15  ;;  %v207_v52 = vadd.f32 %v2453_v10, %v2462_v20 }
 0x12c   :  { %v297_v23 = vmul.f32 %v296_v22, %v2460_v19 }
 0x12e   :  { %2138 = vtanh.f32 %v297_v23  ;;  %v2508_v43 = vpop.f32.mrb[4].mxu0  ;;  %v365_v47 = vpop.f32.mrb[4].mxu1 }
 0x12f   :  { %v2510_v44 = vpop.f32.mrb[5].mxu0  ;;  %v1927_v48 = vpop.f32.mrb[5].mxu1 }
 0x130   :  { %v2512_v45 = vpop.f32.mrb[6].mxu0  ;;  %v368_v49 = vpop.f32.mrb[6].mxu1 }
 0x131   :  { %v2514_v46 = vpop.f32.mrb[7].mxu0  ;;  %v1928_v50 = vpop.f32.mrb[7].mxu1 }
 0x138   :  { %v2139_v24 = vpop.eup %2138 }
 0x139   :  { %v299_v26 = vmul.f32 %v2139_v24, %v2460_v19 }
 0x13b   :  { %v300_v27 = vadd.f32 %v299_v26, %v2465_v25 }
 0x13d   :  { %303 = vrot.lane.b32.xlu0 %v300_v27, %s2301_s21  ;;  %v301_v30 = vmul.f32 0.0, %v300_v27 }
 0x1af   :  { %v304_v28 = vpop.permute.xlu0 %303 }
 0x1b0   :  { %v306_v29 = vmul.f32 %v304_v28, %v300_v27 }
 0x1b2   :  { %308 = vrot.lane.b32.xlu0 %v306_v29, %s2309_s1 }
 0x224   :  { %v309_v31 = vpop.permute.xlu0 %308 }
 0x225   :  { %v2471_v32 = vadd.f32 %v309_v31, %v301_v30 }
 0x227   :  { %2140 = vtanh.f32 %v2471_v32 }
 0x231   :  { %v2141_v39 = vpop.eup %2140 }
 0x232   :  { %314 = vrot.lane.b32.xlu1 %v2141_v39, %s2301_s21 }
 0x2a4   :  { %v315_v40 = vpop.permute.xlu1 %314 }
 0x2a5   :  { %v317_v41 = vmul.f32 %v315_v40, %v300_v27 }
 0x2a7   :  { %v318_v42 = vpack.c.bf16 %v317_v41, %v317_v41 }
 0x2a9   :  { %372 = vrot.lane.b32.xlu1 %v318_v42, %s2309_s1 }
 0x31b   :  { %v373_v51 = vpop.permute.xlu1 %372 }
 0x31c   :  { %1934 = vmatmul.mubr.msk.bf16.vlgmr.msra.gmra.mrb[8].mxu0 %vm156_vm1, %v373_v51  ;;  %1942 = vmatmul.mubr.msk.bf16.vlgmr.msra.gmra.mrb[8].mxu1 %vm156_vm1, %v373_v51 }
 0x31d   :  { %1954 = vmatpush3.bf16.msra.mxu1 %v2479_v34  ;;  %1946 = vmatpush3.bf16.msra.mxu0 %v2474_v33 }
 0x31e   :  { %1955 = vmatprep.subr.bf16.mxu1 %v2305_v0  ;;  %1947 = vmatprep.subr.bf16.mxu0 %v2305_v0 }
 0x31f   :  { %1957 = vmatprep.mubr.msk.bf16.mxu1 %vm2306_vm0, %v2305_v0  ;;  %1949 = vmatprep.mubr.msk.bf16.mxu0 %vm2306_vm0, %v2305_v0 }
 0x321   :  { %1956 = vmatpush3.bf16.msra.mxu1 %v2488_v38  ;;  %1948 = vmatpush3.bf16.msra.mxu0 %v2483_v37 }
 0x322   :  { %1961 = vmatprep.subr.bf16.mxu0 %v2305_v0  ;;  %1969 = vmatprep.subr.bf16.mxu1 %v2305_v0 }
 0x3ef   :  { %v423_v54 = vpop.f32.mrb[8].mxu0  ;;  %v485_v55 = vpop.f32.mrb[8].mxu1 }
 0x3f0   :  { %v424_v56 = vadd.f32 %v423_v54, %v365_v47  ;;  %v491_v57 = vadd.f32 %v485_v55, %v207_v52  ;;  %v1935_v58 = vpop.f32.mrb[9].mxu0  ;;  %v1943_v59 = vpop.f32.mrb[9].mxu1 }
 0x3f1   :  { %v426_v60 = vpop.f32.mrb[10].mxu0  ;;  %v488_v61 = vpop.f32.mrb[10].mxu1 }
 0x3f2   :  { %v429_v62 = vadd.f32 %v2535_v53, %v424_v56  ;;  %v492_v63 = vmul.f32 %v491_v57, %v2460_v19  ;;  %v1936_v1 = vpop.f32.mrb[11].mxu0  ;;  %v1944_v3 = vpop.f32.mrb[11].mxu1  ;;  %v212_v57 = vadd.f32 %v2455_v11, %v2453_v10 }
 0x3f4   :  { %v430_v5 = vmul.f32 %v429_v62, %v2460_v19  ;;  %2142 = vtanh.f32 %v492_v63 }
 0x3f6   :  { %2144 = vtanh.f32 %v430_v5 }
 0x3fe   :  { %v2143_v6 = vpop.eup %2142 }
 0x3ff   :  { %v494_v7 = vmul.f32 %v2143_v6, %v2460_v19 }
 0x400   :  { %v2145_v8 = vpop.eup %2144 }
 0x401   :  { %v495_v9 = vadd.f32 %v494_v7, %v2465_v25  ;;  %v432_v12 = vmul.f32 %v2145_v8, %v2460_v19 }
 0x403   :  { %498 = vrot.lane.b32.xlu1 %v495_v9, %s2301_s21  ;;  %v433_v13 = vadd.f32 %v432_v12, %v2465_v25  ;;  %v496_v20 = vmul.f32 %v495_v9, %v2471_v32 }
 0x405   :  { %436 = vrot.lane.b32.xlu0 %v433_v13, %s2301_s21  ;;  %v434_v23 = vmul.f32 0.0, %v433_v13 }
 0x475   :  { %v499_v14 = vpop.permute.xlu1 %498 }
 0x476   :  { %v501_v15 = vmul.f32 %v499_v14, %v495_v9 }
 0x477   :  { %v437_v17 = vpop.permute.xlu0 %436 }
 0x478   :  { %v439_v18 = vmul.f32 %v437_v17, %v433_v13  ;;  %503 = vrot.lane.b32.xlu1 %v501_v15, %s2309_s1 }
 0x47a   :  { %441 = vrot.lane.b32.xlu0 %v439_v18, %s2309_s1 }
 0x4ea   :  { %v504_v21 = vpop.permute.xlu1 %503 }
 0x4eb   :  { %v2549_v22 = vadd.f32 %v504_v21, %v496_v20 }
 0x4ec   :  { %v442_v24 = vpop.permute.xlu0 %441 }
 0x4ed   :  { %2146 = vtanh.f32 %v2549_v22  ;;  %v2552_v26 = vadd.f32 %v442_v24, %v434_v23 }
 0x4ef   :  { %2148 = vtanh.f32 %v2552_v26 }
 0x4f7   :  { %v2147_v27 = vpop.eup %2146 }
 0x4f8   :  { %509 = vrot.lane.b32.xlu1 %v2147_v27, %s2301_s21 }
 0x4f9   :  { %v2149_v28 = vpop.eup %2148 }
 0x4fa   :  { %447 = vrot.lane.b32.xlu0 %v2149_v28, %s2301_s21 }
 0x56a   :  { %v510_v29 = vpop.permute.xlu1 %509 }
 0x56b   :  { %v512_v30 = vmul.f32 %v510_v29, %v495_v9 }
 0x56c   :  { %v448_v31 = vpop.permute.xlu0 %447 }
 0x56d   :  { %v513_v32 = vpack.c.bf16 %v512_v30, %v512_v30  ;;  %v450_v35 = vmul.f32 %v448_v31, %v433_v13 }
 0x56f   :  { %v514_v36 = vpack.c.bf16 %v450_v35, %v450_v35  ;;  %562 = vrot.lane.b32.xlu1 %v513_v32, %s2309_s1 }
 0x571   :  { %516 = vrot.lane.b32.xlu0 %v514_v36, %s2309_s1 }
 0x5e1   :  { %v563_v39 = vpop.permute.xlu1 %562 }
 0x5e2   :  { %1958 = vmatmul.mubr.msk.bf16.vlgmr.msra.gmra.mrb[12].mxu1 %vm156_vm1, %v563_v39 }
 0x5e3   :  { %v517_v40 = vpop.permute.xlu0 %516  ;;  %1970 = vmatpush3.bf16.msra.mxu1 %v2474_v33  ;;  %1973 = vmatprep.mubr.msk.bf16.mxu1 %vm2306_vm0, %v2305_v0 }
 0x5e4   :  { %1950 = vmatmul.mubr.msk.bf16.vlgmr.msra.gmra.mrb[12].mxu0 %vm156_vm1, %v517_v40  ;;  %1971 = vmatprep.subr.bf16.mxu1 %v2305_v0 }
 0x5e5   :  { %1962 = vmatpush3.bf16.msra.mxu0 %v2437_v2  ;;  %1965 = vmatprep.mubr.msk.bf16.mxu0 %vm2306_vm0, %v2305_v0 }
 0x5e6   :  { %1963 = vmatprep.subr.bf16.mxu0 %v2305_v0 }
 0x5e7   :  { %1972 = vmatpush3.bf16.msra.mxu1 %v2483_v37 }
 0x5e8   :  { %1985 = vmatprep.subr.bf16.mxu1 %v2305_v0 }
 0x5e9   :  { %1964 = vmatpush3.bf16.msra.mxu0 %v2443_v4 }
 0x5ea   :  { %1977 = vmatprep.subr.bf16.mxu0 %v2305_v0 }
 0x5ec   :  { %1966 = vmatmul.mubr.msk.bf16.vlgmr.msra.gmra.mrb[16].mxu0 %vm156_vm1, %v563_v39 }
 0x5ed   :  { %1978 = vmatpush3.bf16.msra.mxu0 %v2479_v34  ;;  %1981 = vmatprep.mubr.msk.bf16.mxu0 %vm2306_vm0, %v2305_v0 }
 0x5ee   :  { %1979 = vmatprep.subr.bf16.mxu0 %v2305_v0 }
 0x5f1   :  { %1980 = vmatpush3.bf16.msra.mxu0 %v2488_v38 }
 0x5f2   :  { %1993 = vmatprep.subr.bf16.mxu0 %v2305_v0 }
 0x6b5   :  { %v601_v41 = vpop.f32.mrb[12].mxu1 }
 0x6b6   :  { %v1959_v42 = vpop.f32.mrb[13].mxu1 }
 0x6b7   :  { %v555_v47 = vpop.f32.mrb[12].mxu0  ;;  %v604_v48 = vpop.f32.mrb[14].mxu1  ;;  %v215_v42 = vadd.f32 %v2458_v16, %v2453_v10 }
 0x6b8   :  { %v602_v49 = vadd.f32 %v601_v41, %v555_v47  ;;  %v1951_v50 = vpop.f32.mrb[13].mxu0  ;;  %v1960_v51 = vpop.f32.mrb[15].mxu1 }
 0x6b9   :  { %v558_v52 = vpop.f32.mrb[14].mxu0 }
 0x6ba   :  { %v607_v54 = vadd.f32 %v2535_v53, %v602_v49  ;;  %v1952_v55 = vpop.f32.mrb[15].mxu0 }
 0x6bc   :  { %v608_v56 = vmul.f32 %v607_v54, %v2460_v19 }
 0x6be   :  { %2150 = vtanh.f32 %v608_v56 }
 0x6bf   :  { %v663_v58 = vpop.f32.mrb[16].mxu0 }
 0x6c0   :  { %v669_v59 = vadd.f32 %v663_v58, %v212_v57  ;;  %v1967_v60 = vpop.f32.mrb[17].mxu0 }
 0x6c1   :  { %v666_v61 = vpop.f32.mrb[18].mxu0 }
 0x6c2   :  { %v670_v62 = vmul.f32 %v669_v59, %v2460_v19  ;;  %v1968_v63 = vpop.f32.mrb[19].mxu0 }
 0x6c4   :  { %2152 = vtanh.f32 %v670_v62 }
 0x6c8   :  { %v2151_v1 = vpop.eup %2150 }
 0x6c9   :  { %v610_v3 = vmul.f32 %v2151_v1, %v2460_v19 }
 0x6cb   :  { %v611_v5 = vadd.f32 %v610_v3, %v2465_v25 }
 0x6cd   :  { %614 = vrot.lane.b32.xlu0 %v611_v5, %s2301_s21  ;;  %v612_v14 = vmul.f32 %v611_v5, %v2552_v26 }
 0x6ce   :  { %v2153_v6 = vpop.eup %2152 }
 0x6cf   :  { %v672_v7 = vmul.f32 %v2153_v6, %v2460_v19 }
 0x6d1   :  { %v673_v11 = vadd.f32 %v672_v7, %v2465_v25 }
 0x6d3   :  { %676 = vrot.lane.b32.xlu1 %v673_v11, %s2301_s21  ;;  %v674_v18 = vmul.f32 %v673_v11, %v2549_v22 }
 0x73f   :  { %v615_v8 = vpop.permute.xlu0 %614 }
 0x740   :  { %v617_v9 = vmul.f32 %v615_v8, %v611_v5 }
 0x742   :  { %619 = vrot.lane.b32.xlu0 %v617_v9, %s2309_s1 }
 0x745   :  { %v677_v12 = vpop.permute.xlu1 %676 }
 0x746   :  { %v679_v13 = vmul.f32 %v677_v12, %v673_v11 }
 0x748   :  { %681 = vrot.lane.b32.xlu1 %v679_v13, %s2309_s1 }
 0x7b4   :  { %v620_v15 = vpop.permute.xlu0 %619 }
 0x7b5   :  { %v2594_v17 = vadd.f32 %v620_v15, %v612_v14 }
 0x7b7   :  { %2154 = vtanh.f32 %v2594_v17 }
 0x7ba   :  { %v682_v20 = vpop.permute.xlu1 %681 }
 0x7bb   :  { %v2598_v21 = vadd.f32 %v682_v20, %v674_v18 }
 0x7bd   :  { %2156 = vtanh.f32 %v2598_v21 }
 0x7c1   :  { %v2155_v23 = vpop.eup %2154 }
 0x7c2   :  { %625 = vrot.lane.b32.xlu0 %v2155_v23, %s2301_s21 }
 0x7c7   :  { %v2157_v24 = vpop.eup %2156 }
 0x7c8   :  { %687 = vrot.lane.b32.xlu1 %v2157_v24, %s2301_s21 }
 0x834   :  { %v626_v27 = vpop.permute.xlu0 %625 }
 0x835   :  { %v628_v26 = vmul.f32 %v626_v27, %v611_v5 }
 0x837   :  { %v692_v28 = vpack.c.bf16 %v628_v26, %v628_v26 }
 0x839   :  { %694 = vrot.lane.b32.xlu0 %v692_v28, %s2309_s1 }
 0x83a   :  { %v688_v29 = vpop.permute.xlu1 %687 }
 0x83b   :  { %v690_v30 = vmul.f32 %v688_v29, %v673_v11 }
 0x83d   :  { %v691_v31 = vpack.c.bf16 %v690_v30, %v690_v30 }
 0x83f   :  { %740 = vrot.lane.b32.xlu1 %v691_v31, %s2309_s1 }
 0x8ab   :  { %v695_v22 = vpop.permute.xlu0 %694 }
 0x8ac   :  { %1974 = vmatmul.mubr.msk.bf16.vlgmr.msra.gmra.mrb[16].mxu1 %vm156_vm1, %v695_v22 }
 0x8ad   :  { %1986 = vmatpush3.bf16.msra.mxu1 %v2437_v2  ;;  %1989 = vmatprep.mubr.msk.bf16.mxu1 %vm2306_vm0, %v2305_v0 }
 0x8ae   :  { %1987 = vmatprep.subr.bf16.mxu1 %v2305_v0 }
 0x8b1   :  { %1988 = vmatpush3.bf16.msra.mxu1 %v2443_v4  ;;  %v741_v32 = vpop.permute.xlu1 %740 }
 0x8b2   :  { %1982 = vmatmul.mubr.msk.bf16.vlgmr.msra.gmra.mrb[20].mxu0 %vm156_vm1, %v741_v32  ;;  %2001 = vmatprep.subr.bf16.mxu1 %v2305_v0 }
 0x8b3   :  { %1994 = vmatpush3.bf16.msra.mxu0 %v2474_v33  ;;  %1997 = vmatprep.mubr.msk.bf16.mxu0 %vm2306_vm0, %v2305_v0 }
 0x8b4   :  { %1990 = vmatmul.mubr.msk.bf16.vlgmr.msra.gmra.mrb[20].mxu1 %vm156_vm1, %v741_v32  ;;  %1995 = vmatprep.subr.bf16.mxu0 %v2305_v0 }
 0x8b5   :  { %2002 = vmatpush3.bf16.msra.mxu1 %v2479_v34  ;;  %2005 = vmatprep.mubr.msk.bf16.mxu1 %vm2306_vm0, %v2305_v0 }
 0x8b6   :  { %2003 = vmatprep.subr.bf16.mxu1 %v2305_v0 }
 0x8b7   :  { %1996 = vmatpush3.bf16.msra.mxu0 %v2483_v37 }
 0x8b8   :  { %2009 = vmatprep.subr.bf16.mxu0 %v2305_v0 }
 0x8b9   :  { %2004 = vmatpush3.bf16.msra.mxu1 %v2488_v38 }
 0x8ba   :  { %2017 = vmatprep.subr.bf16.mxu1 %v2305_v0 }
 0x97f   :  { %v733_v35 = vpop.f32.mrb[16].mxu1 }
 0x980   :  { %v1975_v36 = vpop.f32.mrb[17].mxu1 }
 0x981   :  { %v736_v39 = vpop.f32.mrb[18].mxu1 }
 0x982   :  { %v1976_v40 = vpop.f32.mrb[19].mxu1 }
 0x985   :  { %v779_v41 = vpop.f32.mrb[20].mxu0 }
 0x986   :  { %v780_v47 = vadd.f32 %v779_v41, %v733_v35  ;;  %v1983_v48 = vpop.f32.mrb[21].mxu0 }
 0x987   :  { %v782_v49 = vpop.f32.mrb[22].mxu0  ;;  %v841_v50 = vpop.f32.mrb[20].mxu1 }
 0x988   :  { %v785_v51 = vadd.f32 %v2535_v53, %v780_v47  ;;  %v847_v52 = vadd.f32 %v841_v50, %v215_v42  ;;  %v1984_v54 = vpop.f32.mrb[23].mxu0  ;;  %v1991_v55 = vpop.f32.mrb[21].mxu1  ;;  %v220_v47 = vadd.f32 %v2453_v10, %v2510_v44 }
 0x989   :  { %v844_v56 = vpop.f32.mrb[22].mxu1 }
 0x98a   :  { %v786_v57 = vmul.f32 %v785_v51, %v2460_v19  ;;  %v848_v58 = vmul.f32 %v847_v52, %v2460_v19  ;;  %v1992_v59 = vpop.f32.mrb[23].mxu1 }
 0x98c   :  { %2158 = vtanh.f32 %v786_v57 }
 0x98d   :  { %2160 = vtanh.f32 %v848_v58 }
 0x996   :  { %v2159_v60 = vpop.eup %2158 }
 0x997   :  { %v2161_v61 = vpop.eup %2160  ;;  %v788_v16 = vmul.f32 %v2159_v60, %v2460_v19 }
 0x998   :  { %v850_v62 = vmul.f32 %v2161_v61, %v2460_v19 }
 0x999   :  { %v789_v63 = vadd.f32 %v788_v16, %v2465_v25 }
 0x99a   :  { %v851_v1 = vadd.f32 %v850_v62, %v2465_v25 }
 0x99b   :  { %792 = vrot.lane.b32.xlu0 %v789_v63, %s2301_s21  ;;  %v790_v11 = vmul.f32 %v789_v63, %v2594_v17 }
 0x99c   :  { %854 = vrot.lane.b32.xlu1 %v851_v1, %s2301_s21  ;;  %v852_v9 = vmul.f32 %v851_v1, %v2598_v21 }
 0xa0d   :  { %v793_v3 = vpop.permute.xlu0 %792 }
 0xa0e   :  { %v795_v5 = vmul.f32 %v793_v3, %v789_v63  ;;  %v855_v6 = vpop.permute.xlu1 %854 }
 0xa0f   :  { %v857_v7 = vmul.f32 %v855_v6, %v851_v1 }
 0xa10   :  { %797 = vrot.lane.b32.xlu0 %v795_v5, %s2309_s1 }
 0xa11   :  { %859 = vrot.lane.b32.xlu1 %v857_v7, %s2309_s1 }
 0xa82   :  { %v798_v8 = vpop.permute.xlu0 %797 }
 0xa83   :  { %v2641_v12 = vadd.f32 %v798_v8, %v790_v11  ;;  %v860_v13 = vpop.permute.xlu1 %859 }
 0xa84   :  { %v2643_v14 = vadd.f32 %v860_v13, %v852_v9 }
 0xa85   :  { %2162 = vtanh.f32 %v2641_v12 }
 0xa86   :  { %2164 = vtanh.f32 %v2643_v14 }
 0xa8f   :  { %v2163_v15 = vpop.eup %2162 }
 0xa90   :  { %v2165_v18 = vpop.eup %2164  ;;  %803 = vrot.lane.b32.xlu0 %v2163_v15, %s2301_s21 }
 0xa91   :  { %865 = vrot.lane.b32.xlu1 %v2165_v18, %s2301_s21 }
 0xb02   :  { %v804_v20 = vpop.permute.xlu0 %803 }
 0xb03   :  { %v806_v17 = vmul.f32 %v804_v20, %v789_v63  ;;  %v866_v23 = vpop.permute.xlu1 %865 }
 0xb04   :  { %v868_v24 = vmul.f32 %v866_v23, %v851_v1 }
 0xb05   :  { %v870_v21 = vpack.c.bf16 %v806_v17, %v806_v17 }
 0xb06   :  { %v869_v27 = vpack.c.bf16 %v868_v24, %v868_v24 }
 0xb07   :  { %872 = vrot.lane.b32.xlu0 %v870_v21, %s2309_s1 }
 0xb08   :  { %918 = vrot.lane.b32.xlu1 %v869_v27, %s2309_s1 }
 0xb79   :  { %v873_v26 = vpop.permute.xlu0 %872 }
 0xb7a   :  { %v919_v28 = vpop.permute.xlu1 %918  ;;  %1998 = vmatmul.mubr.msk.bf16.vlgmr.msra.gmra.mrb[24].mxu0 %vm156_vm1, %v873_v26 }
 0xb7b   :  { %2006 = vmatmul.mubr.msk.bf16.vlgmr.msra.gmra.mrb[24].mxu1 %vm156_vm1, %v919_v28  ;;  %2010 = vmatpush3.bf16.msra.mxu0 %v2437_v2 }
 0xb7c   :  { %2011 = vmatprep.subr.bf16.mxu0 %v2305_v0  ;;  %2013 = vmatprep.mubr.msk.bf16.mxu0 %vm2306_vm0, %v2305_v0 }
 0xb7d   :  { %2018 = vmatpush3.bf16.msra.mxu1 %v2474_v33  ;;  %2021 = vmatprep.mubr.msk.bf16.mxu1 %vm2306_vm0, %v2305_v0 }
 0xb7e   :  { %2019 = vmatprep.subr.bf16.mxu1 %v2305_v0 }
 0xb7f   :  { %2012 = vmatpush3.bf16.msra.mxu0 %v2443_v4 }
 0xb80   :  { %2025 = vmatprep.subr.bf16.mxu0 %v2305_v0 }
 0xb81   :  { %2020 = vmatpush3.bf16.msra.mxu1 %v2483_v37 }
 0xb82   :  { %2014 = vmatmul.mubr.msk.bf16.vlgmr.msra.gmra.mrb[28].mxu0 %vm156_vm1, %v919_v28  ;;  %2033 = vmatprep.subr.bf16.mxu1 %v2305_v0 }
 0xb83   :  { %2026 = vmatpush3.bf16.msra.mxu0 %v2479_v34  ;;  %2029 = vmatprep.mubr.msk.bf16.mxu0 %vm2306_vm0, %v2305_v0 }
 0xb84   :  { %2027 = vmatprep.subr.bf16.mxu0 %v2305_v0 }
 0xb87   :  { %2028 = vmatpush3.bf16.msra.mxu0 %v2488_v38 }
 0xb88   :  { %2041 = vmatprep.subr.bf16.mxu0 %v2305_v0 }
 0xc4d   :  { %v911_v29 = vpop.f32.mrb[24].mxu0 }
 0xc4e   :  { %v957_v30 = vpop.f32.mrb[24].mxu1  ;;  %v1999_v31 = vpop.f32.mrb[25].mxu0 }
 0xc4f   :  { %v958_v22 = vadd.f32 %v957_v30, %v911_v29  ;;  %v2007_v32 = vpop.f32.mrb[25].mxu1  ;;  %v914_v35 = vpop.f32.mrb[26].mxu0  ;;  %v223_v30 = vadd.f32 %v2453_v10, %v2514_v46 }
 0xc50   :  { %v960_v36 = vpop.f32.mrb[26].mxu1  ;;  %v2000_v39 = vpop.f32.mrb[27].mxu0 }
 0xc51   :  { %v963_v40 = vadd.f32 %v2535_v53, %v958_v22  ;;  %v2008_v41 = vpop.f32.mrb[27].mxu1 }
 0xc53   :  { %v964_v42 = vmul.f32 %v963_v40, %v2460_v19 }
 0xc55   :  { %2166 = vtanh.f32 %v964_v42  ;;  %v1019_v48 = vpop.f32.mrb[28].mxu0 }
 0xc56   :  { %v1025_v49 = vadd.f32 %v1019_v48, %v220_v47  ;;  %v2015_v50 = vpop.f32.mrb[29].mxu0 }
 0xc57   :  { %v1022_v51 = vpop.f32.mrb[30].mxu0 }
 0xc58   :  { %v1026_v52 = vmul.f32 %v1025_v49, %v2460_v19  ;;  %v2016_v54 = vpop.f32.mrb[31].mxu0 }
 0xc5a   :  { %2168 = vtanh.f32 %v1026_v52 }
 0xc5f   :  { %v2167_v55 = vpop.eup %2166 }
 0xc60   :  { %v966_v56 = vmul.f32 %v2167_v55, %v2460_v19 }
 0xc62   :  { %v967_v57 = vadd.f32 %v966_v56, %v2465_v25 }
 0xc64   :  { %v2169_v58 = vpop.eup %2168  ;;  %970 = vrot.lane.b32.xlu0 %v967_v57, %s2301_s21  ;;  %v968_v63 = vmul.f32 %v967_v57, %v2641_v12 }
 0xc65   :  { %v1028_v59 = vmul.f32 %v2169_v58, %v2460_v19 }
 0xc67   :  { %v1029_v44 = vadd.f32 %v1028_v59, %v2465_v25 }
 0xc69   :  { %1032 = vrot.lane.b32.xlu1 %v1029_v44, %s2301_s21  ;;  %v1030_v5 = vmul.f32 %v1029_v44, %v2643_v14 }
 0xcd6   :  { %v971_v60 = vpop.permute.xlu0 %970 }
 0xcd7   :  { %v973_v61 = vmul.f32 %v971_v60, %v967_v57 }
 0xcd9   :  { %975 = vrot.lane.b32.xlu0 %v973_v61, %s2309_s1 }
 0xcdb   :  { %v1033_v16 = vpop.permute.xlu1 %1032 }
 0xcdc   :  { %v1035_v62 = vmul.f32 %v1033_v16, %v1029_v44 }
 0xcde   :  { %1037 = vrot.lane.b32.xlu1 %v1035_v62, %s2309_s1 }
 0xd4b   :  { %v976_v1 = vpop.permute.xlu0 %975 }
 0xd4c   :  { %v2686_v3 = vadd.f32 %v976_v1, %v968_v63 }
 0xd4e   :  { %2170 = vtanh.f32 %v2686_v3 }
 0xd50   :  { %v1038_v6 = vpop.permute.xlu1 %1037 }
 0xd51   :  { %v2690_v7 = vadd.f32 %v1038_v6, %v1030_v5 }
 0xd53   :  { %2172 = vtanh.f32 %v2690_v7 }
 0xd58   :  { %v2171_v11 = vpop.eup %2170 }
 0xd59   :  { %981 = vrot.lane.b32.xlu0 %v2171_v11, %s2301_s21 }
 0xd5d   :  { %v2173_v8 = vpop.eup %2172 }
 0xd5e   :  { %1043 = vrot.lane.b32.xlu1 %v2173_v8, %s2301_s21 }
 0xdcb   :  { %v982_v9 = vpop.permute.xlu0 %981 }
 0xdcc   :  { %v984_v12 = vmul.f32 %v982_v9, %v967_v57 }
 0xdce   :  { %v1048_v13 = vpack.c.bf16 %v984_v12, %v984_v12 }
 0xdd0   :  { %1050 = vrot.lane.b32.xlu0 %v1048_v13, %s2309_s1  ;;  %v1044_v15 = vpop.permute.xlu1 %1043 }
 0xdd1   :  { %v1046_v18 = vmul.f32 %v1044_v15, %v1029_v44 }
 0xdd3   :  { %v1047_v20 = vpack.c.bf16 %v1046_v18, %v1046_v18 }
 0xdd5   :  { %1096 = vrot.lane.b32.xlu1 %v1047_v20, %s2309_s1 }
 0xe42   :  { %v1051_v14 = vpop.permute.xlu0 %1050 }
 0xe43   :  { %2022 = vmatmul.mubr.msk.bf16.vlgmr.msra.gmra.mrb[28].mxu1 %vm156_vm1, %v1051_v14 }
 0xe44   :  { %2034 = vmatpush3.bf16.msra.mxu1 %v2437_v2  ;;  %2037 = vmatprep.mubr.msk.bf16.mxu1 %vm2306_vm0, %v2305_v0 }
 0xe45   :  { %2035 = vmatprep.subr.bf16.mxu1 %v2305_v0 }
 0xe47   :  { %v1097_v17 = vpop.permute.xlu1 %1096 }
 0xe48   :  { %2036 = vmatpush3.bf16.msra.mxu1 %v2443_v4  ;;  %2030 = vmatmul.mubr.msk.bf16.vlgmr.msra.gmra.mrb[32].mxu0 %vm156_vm1, %v1097_v17 }
 0xe49   :  { %2049 = vmatprep.subr.bf16.mxu1 %v2305_v0  ;;  %2042 = vmatpush3.bf16.msra.mxu0 %v2474_v33 }
 0xe4a   :  { %2043 = vmatprep.subr.bf16.mxu0 %v2305_v0  ;;  %2045 = vmatprep.mubr.msk.bf16.mxu0 %vm2306_vm0, %v2305_v0 }
 0xe4b   :  { %2038 = vmatmul.mubr.msk.bf16.vlgmr.msra.gmra.mrb[32].mxu1 %vm156_vm1, %v1097_v17 }
 0xe4c   :  { %2050 = vmatpush3.bf16.msra.mxu1 %v2479_v34  ;;  %2053 = vmatprep.mubr.msk.bf16.mxu1 %vm2306_vm0, %v2305_v0 }
 0xe4d   :  { %2051 = vmatprep.subr.bf16.mxu1 %v2305_v0  ;;  %2044 = vmatpush3.bf16.msra.mxu0 %v2483_v37 }
 0xe4e   :  { %2057 = vmatprep.subr.bf16.mxu0 %v2305_v0 }
 0xe50   :  { %2052 = vmatpush3.bf16.msra.mxu1 %v2488_v38 }
 0xe51   :  { %2065 = vmatprep.subr.bf16.mxu1 %v2305_v0 }
 0xf16   :  { %v1089_v23 = vpop.f32.mrb[28].mxu1 }
 0xf17   :  { %v2023_v24 = vpop.f32.mrb[29].mxu1 }
 0xf18   :  { %v1092_v21 = vpop.f32.mrb[30].mxu1 }
 0xf19   :  { %v2024_v27 = vpop.f32.mrb[31].mxu1  ;;  %v228_v21 = vadd.f32 %v2508_v43, %v2453_v10 }
 0xf1b   :  { %v1135_v26 = vpop.f32.mrb[32].mxu0 }
 0xf1c   :  { %v1136_v28 = vadd.f32 %v1135_v26, %v1089_v23  ;;  %v2031_v29 = vpop.f32.mrb[33].mxu0 }
 0xf1d   :  { %v1138_v31 = vpop.f32.mrb[34].mxu0 }
 0xf1e   :  { %v1141_v22 = vadd.f32 %v2535_v53, %v1136_v28  ;;  %v1197_v32 = vpop.f32.mrb[32].mxu1  ;;  %v2032_v35 = vpop.f32.mrb[35].mxu0 }
 0xf1f   :  { %v1203_v36 = vadd.f32 %v1197_v32, %v223_v30  ;;  %v2039_v39 = vpop.f32.mrb[33].mxu1 }
 0xf20   :  { %v1142_v40 = vmul.f32 %v1141_v22, %v2460_v19  ;;  %v1200_v41 = vpop.f32.mrb[34].mxu1 }
 0xf21   :  { %v1204_v42 = vmul.f32 %v1203_v36, %v2460_v19  ;;  %v2040_v47 = vpop.f32.mrb[35].mxu1 }
 0xf22   :  { %2174 = vtanh.f32 %v1142_v40 }
 0xf23   :  { %2176 = vtanh.f32 %v1204_v42 }
 0xf2c   :  { %v2175_v48 = vpop.eup %2174 }
 0xf2d   :  { %v2177_v49 = vpop.eup %2176  ;;  %v1144_v50 = vmul.f32 %v2175_v48, %v2460_v19 }
 0xf2e   :  { %v1206_v46 = vmul.f32 %v2177_v49, %v2460_v19 }
 0xf2f   :  { %v1145_v51 = vadd.f32 %v1144_v50, %v2465_v25 }
 0xf30   :  { %v1207_v52 = vadd.f32 %v1206_v46, %v2465_v25 }
 0xf31   :  { %1148 = vrot.lane.b32.xlu0 %v1145_v51, %s2301_s21  ;;  %v1146_v58 = vmul.f32 %v1145_v51, %v2686_v3 }
 0xf32   :  { %1210 = vrot.lane.b32.xlu1 %v1207_v52, %s2301_s21  ;;  %v1208_v44 = vmul.f32 %v1207_v52, %v2690_v7 }
 0xfa3   :  { %v1149_v54 = vpop.permute.xlu0 %1148 }
 0xfa4   :  { %v1151_v55 = vmul.f32 %v1149_v54, %v1145_v51  ;;  %v1211_v56 = vpop.permute.xlu1 %1210 }
 0xfa5   :  { %v1213_v57 = vmul.f32 %v1211_v56, %v1207_v52 }
 0xfa6   :  { %1153 = vrot.lane.b32.xlu0 %v1151_v55, %s2309_s1 }
 0xfa7   :  { %1215 = vrot.lane.b32.xlu1 %v1213_v57, %s2309_s1 }
0x1018   :  { %v1154_v59 = vpop.permute.xlu0 %1153 }
0x1019   :  { %v2733_v60 = vadd.f32 %v1154_v59, %v1146_v58  ;;  %v1216_v61 = vpop.permute.xlu1 %1215 }
0x101a   :  { %v2735_v16 = vadd.f32 %v1216_v61, %v1208_v44  ;;  %v2202_v61 = vld [vmem:[#allocation4] sm:$0xff]  }
0x101b   :  { %2178 = vtanh.f32 %v2733_v60 }
0x101c   :  { %2180 = vtanh.f32 %v2735_v16 }
0x1025   :  { %v2179_v62 = vpop.eup %2178 }
0x1026   :  { %v2181_v63 = vpop.eup %2180  ;;  %1159 = vrot.lane.b32.xlu0 %v2179_v62, %s2301_s21  ;;  %v2203_v62 = vld [vmem:[#allocation4 + $0x8] sm:$0xff]  }
0x1027   :  { %1221 = vrot.lane.b32.xlu1 %v2181_v63, %s2301_s21 }
0x1098   :  { %v1160_v1 = vpop.permute.xlu0 %1159 }
0x1099   :  { %v1162_v3 = vmul.f32 %v1160_v1, %v1145_v51  ;;  %v1222_v5 = vpop.permute.xlu1 %1221 }
0x109a   :  { %v1224_v6 = vmul.f32 %v1222_v5, %v1207_v52 }
0x109b   :  { %v1226_v7 = vpack.c.bf16 %v1162_v3, %v1162_v3 }
0x109c   :  { %v1225_v11 = vpack.c.bf16 %v1224_v6, %v1224_v6 }
0x109d   :  { %1228 = vrot.lane.b32.xlu0 %v1226_v7, %s2309_s1 }
0x109e   :  { %1274 = vrot.lane.b32.xlu1 %v1225_v11, %s2309_s1  ;;  %v2204_v11 = vld [vmem:[#allocation6] ss:$0 sm:$0xff] }
0x110f   :  { %v1229_v8 = vpop.permute.xlu0 %1228 }
0x1110   :  { %v1275_v9 = vpop.permute.xlu1 %1274  ;;  %2046 = vmatmul.mubr.msk.bf16.vlgmr.msra.gmra.mrb[36].mxu0 %vm156_vm1, %v1229_v8 }
0x1111   :  { %2054 = vmatmul.mubr.msk.bf16.vlgmr.msra.gmra.mrb[36].mxu1 %vm156_vm1, %v1275_v9  ;;  %2058 = vmatpush3.bf16.msra.mxu0 %v2437_v2 }
0x1112   :  { %2059 = vmatprep.subr.bf16.mxu0 %v2305_v0  ;;  %2061 = vmatprep.mubr.msk.bf16.mxu0 %vm2306_vm0, %v2305_v0 }
0x1113   :  { %2066 = vmatpush3.bf16.msra.mxu1 %v2474_v33  ;;  %2069 = vmatprep.mubr.msk.bf16.mxu1 %vm2306_vm0, %v2305_v0 }
0x1114   :  { %2067 = vmatprep.subr.bf16.mxu1 %v2305_v0 }
0x1115   :  { %2060 = vmatpush3.bf16.msra.mxu0 %v2443_v4 }
0x1116   :  { %2073 = vmatprep.subr.bf16.mxu0 %v2305_v0 }
0x1117   :  { %2068 = vmatpush3.bf16.msra.mxu1 %v2483_v37 }
0x1118   :  { %2062 = vmatmul.mubr.msk.bf16.vlgmr.msra.gmra.mrb[40].mxu0 %vm156_vm1, %v1275_v9  ;;  %2081 = vmatprep.subr.bf16.mxu1 %v2305_v0 }
0x1119   :  { %2074 = vmatpush3.bf16.msra.mxu0 %v2479_v34  ;;  %2077 = vmatprep.mubr.msk.bf16.mxu0 %vm2306_vm0, %v2305_v0 }
0x111a   :  { %2075 = vmatprep.subr.bf16.mxu0 %v2305_v0 }
0x111d   :  { %2076 = vmatpush3.bf16.msra.mxu0 %v2488_v38 }
0x111e   :  { %2089 = vmatprep.subr.bf16.mxu0 %v2305_v0 }
0x11e3   :  { %v1267_v2 = vpop.f32.mrb[36].mxu0 }
0x11e4   :  { %v1313_v4 = vpop.f32.mrb[36].mxu1  ;;  %v2047_v12 = vpop.f32.mrb[37].mxu0 }
0x11e5   :  { %v1314_v13 = vadd.f32 %v1313_v4, %v1267_v2  ;;  %v2055_v15 = vpop.f32.mrb[37].mxu1  ;;  %v1270_v18 = vpop.f32.mrb[38].mxu0 }
0x11e6   :  { %v1316_v20 = vpop.f32.mrb[38].mxu1  ;;  %v2048_v14 = vpop.f32.mrb[39].mxu0 }
0x11e7   :  { %v1319_v17 = vadd.f32 %v2535_v53, %v1314_v13  ;;  %v2056_v23 = vpop.f32.mrb[39].mxu1 }
0x11e9   :  { %v1320_v24 = vmul.f32 %v1319_v17, %v2460_v19 }
0x11eb   :  { %2182 = vtanh.f32 %v1320_v24  ;;  %v1375_v27 = vpop.f32.mrb[40].mxu0 }
0x11ec   :  { %v1381_v26 = vadd.f32 %v1375_v27, %v228_v21  ;;  %v2063_v28 = vpop.f32.mrb[41].mxu0 }
0x11ed   :  { %v1378_v29 = vpop.f32.mrb[42].mxu0 }
0x11ee   :  { %v1382_v30 = vmul.f32 %v1381_v26, %v2460_v19  ;;  %v2064_v31 = vpop.f32.mrb[43].mxu0 }
0x11f0   :  { %2184 = vtanh.f32 %v1382_v30 }
0x11f5   :  { %v2183_v22 = vpop.eup %2182 }
0x11f6   :  { %v1322_v32 = vmul.f32 %v2183_v22, %v2460_v19 }
0x11f8   :  { %v1323_v35 = vadd.f32 %v1322_v32, %v2465_v25 }
0x11fa   :  { %v2185_v36 = vpop.eup %2184  ;;  %1326 = vrot.lane.b32.xlu0 %v1323_v35, %s2301_s21  ;;  %v1324_v47 = vmul.f32 %v1323_v35, %v2733_v60 }
0x11fb   :  { %v1384_v39 = vmul.f32 %v2185_v36, %v2460_v19 }
0x11fd   :  { %v1385_v10 = vadd.f32 %v1384_v39, %v2465_v25 }
0x11ff   :  { %1388 = vrot.lane.b32.xlu1 %v1385_v10, %s2301_s21  ;;  %v1386_v50 = vmul.f32 %v1385_v10, %v2735_v16 }
0x126c   :  { %v1327_v43 = vpop.permute.xlu0 %1326 }
0x126d   :  { %v1329_v40 = vmul.f32 %v1327_v43, %v1323_v35 }
0x126f   :  { %1331 = vrot.lane.b32.xlu0 %v1329_v40, %s2309_s1 }
0x1271   :  { %v1389_v41 = vpop.permute.xlu1 %1388 }
0x1272   :  { %v1391_v42 = vmul.f32 %v1389_v41, %v1385_v10 }
0x1274   :  { %1393 = vrot.lane.b32.xlu1 %v1391_v42, %s2309_s1 }
0x12e1   :  { %v1332_v48 = vpop.permute.xlu0 %1331 }
0x12e2   :  { %v2778_v49 = vadd.f32 %v1332_v48, %v1324_v47 }
0x12e4   :  { %2186 = vtanh.f32 %v2778_v49 }
0x12e6   :  { %v1394_v46 = vpop.permute.xlu1 %1393 }
0x12e7   :  { %v2782_v51 = vadd.f32 %v1394_v46, %v1386_v50 }
0x12e9   :  { %2188 = vtanh.f32 %v2782_v51 }
0x12ee   :  { %v2187_v52 = vpop.eup %2186 }
0x12ef   :  { %1337 = vrot.lane.b32.xlu0 %v2187_v52, %s2301_s21 }
0x12f3   :  { %v2189_v54 = vpop.eup %2188 }
0x12f4   :  { %1399 = vrot.lane.b32.xlu1 %v2189_v54, %s2301_s21 }
0x1361   :  { %v1338_v55 = vpop.permute.xlu0 %1337 }
0x1362   :  { %v1340_v56 = vmul.f32 %v1338_v55, %v1323_v35 }
0x1364   :  { %v1404_v57 = vpack.c.bf16 %v1340_v56, %v1340_v56 }
0x1366   :  { %1406 = vrot.lane.b32.xlu0 %v1404_v57, %s2309_s1  ;;  %v1400_v58 = vpop.permute.xlu1 %1399 }
0x1367   :  { %v1402_v59 = vmul.f32 %v1400_v58, %v1385_v10 }
0x1369   :  { %v1403_v44 = vpack.c.bf16 %v1402_v59, %v1402_v59 }
0x136b   :  { %1452 = vrot.lane.b32.xlu1 %v1403_v44, %s2309_s1 }
0x13d8   :  { %v1407_v60 = vpop.permute.xlu0 %1406 }
0x13d9   :  { %2070 = vmatmul.mubr.msk.bf16.vlgmr.msra.gmra.mrb[40].mxu1 %vm156_vm1, %v1407_v60 }
0x13da   :  { %2082 = vmatpush3.bf16.msra.mxu1 %v2202_v61  ;;  %2085 = vmatprep.mubr.msk.bf16.mxu1 %vm2306_vm0, %v2305_v0 }
0x13db   :  { %2083 = vmatprep.subr.bf16.mxu1 %v2305_v0 }
0x13dd   :  { %v1453_v16 = vpop.permute.xlu1 %1452 }
0x13de   :  { %2084 = vmatpush3.bf16.msra.mxu1 %v2203_v62  ;;  %2078 = vmatmul.mubr.msk.bf16.vlgmr.msra.gmra.mrb[44].mxu0 %vm156_vm1, %v1453_v16 }
0x13df   :  { %2097 = vmatprep.subr.bf16.mxu1 %v2305_v0  ;;  %2090 = vmatpush3.bf16.msra.mxu0 %v2474_v33 }
0x13e0   :  { %2091 = vmatprep.subr.bf16.mxu0 %v2305_v0  ;;  %2093 = vmatprep.mubr.msk.bf16.mxu0 %vm2306_vm0, %v2305_v0 }
0x13e1   :  { %2086 = vmatmul.mubr.msk.bf16.vlgmr.msra.gmra.mrb[44].mxu1 %vm156_vm1, %v1453_v16 }
0x13e2   :  { %2098 = vmatpush3.bf16.msra.mxu1 %v2479_v34  ;;  %2101 = vmatprep.mubr.msk.bf16.mxu1 %vm2306_vm0, %v2305_v0  ;;  %v231_v34 = vadd.f32 %v2204_v11, %v2512_v45 }
0x13e3   :  { %2099 = vmatprep.subr.bf16.mxu1 %v2305_v0  ;;  %2092 = vmatpush3.bf16.msra.mxu0 %v2483_v37 }
0x13e4   :  { %2105 = vmatprep.subr.bf16.mxu0 %v2305_v0 }
0x13e6   :  { %2100 = vmatpush3.bf16.msra.mxu1 %v2488_v38 }
0x14ac   :  { %v1445_v33 = vpop.f32.mrb[40].mxu1 }
0x14ad   :  { %v2071_v63 = vpop.f32.mrb[41].mxu1 }
0x14ae   :  { %v1448_v1 = vpop.f32.mrb[42].mxu1 }
0x14af   :  { %v2072_v3 = vpop.f32.mrb[43].mxu1 }
0x14b1   :  { %v1491_v5 = vpop.f32.mrb[44].mxu0 }
0x14b2   :  { %v1492_v6 = vadd.f32 %v1491_v5, %v1445_v33  ;;  %v2079_v7 = vpop.f32.mrb[45].mxu0 }
0x14b3   :  { %v1494_v8 = vpop.f32.mrb[46].mxu0 }
0x14b4   :  { %v1497_v9 = vadd.f32 %v2535_v53, %v1492_v6  ;;  %v1553_v2 = vpop.f32.mrb[44].mxu1  ;;  %v2080_v4 = vpop.f32.mrb[47].mxu0 }
0x14b5   :  { %v1559_v37 = vadd.f32 %v1553_v2, %v231_v34  ;;  %v2087_v12 = vpop.f32.mrb[45].mxu1  ;;  %v1816_v34 = vld [vmem:[%s2859_s8] ss:$0 sm:$0xff] }
0x14b6   :  { %v1498_v13 = vmul.f32 %v1497_v9, %v2460_v19  ;;  %v1556_v38 = vpop.f32.mrb[46].mxu1 }
0x14b7   :  { %v1560_v15 = vmul.f32 %v1559_v37, %v2460_v19  ;;  %v2088_v18 = vpop.f32.mrb[47].mxu1 }
0x14b8   :  { %2190 = vtanh.f32 %v1498_v13 }
0x14b9   :  { %2192 = vtanh.f32 %v1560_v15 }
0x14c2   :  { %v2191_v20 = vpop.eup %2190 }
0x14c3   :  { %v2193_v14 = vpop.eup %2192  ;;  %v1500_v17 = vmul.f32 %v2191_v20, %v2460_v19 }
0x14c4   :  { %v1562_v45 = vmul.f32 %v2193_v14, %v2460_v19 }
0x14c5   :  { %v1501_v23 = vadd.f32 %v1500_v17, %v2465_v25 }
0x14c6   :  { %v1563_v24 = vadd.f32 %v1562_v45, %v2465_v25 }
0x14c7   :  { %1504 = vrot.lane.b32.xlu0 %v1501_v23, %s2301_s21  ;;  %v1502_v29 = vmul.f32 %v1501_v23, %v2778_v49 }
0x14c8   :  { %1566 = vrot.lane.b32.xlu1 %v1563_v24, %s2301_s21  ;;  %v1564_v31 = vmul.f32 %v1563_v24, %v2782_v51 }
0x1539   :  { %v1505_v21 = vpop.permute.xlu0 %1504 }
0x153a   :  { %v1507_v27 = vmul.f32 %v1505_v21, %v1501_v23  ;;  %v1567_v26 = vpop.permute.xlu1 %1566 }
0x153b   :  { %v1569_v28 = vmul.f32 %v1567_v26, %v1563_v24 }
0x153c   :  { %1509 = vrot.lane.b32.xlu0 %v1507_v27, %s2309_s1 }
0x153d   :  { %1571 = vrot.lane.b32.xlu1 %v1569_v28, %s2309_s1 }
0x15ae   :  { %v1510_v30 = vpop.permute.xlu0 %1509 }
0x15af   :  { %v1512_v22 = vadd.f32 %v1510_v30, %v1502_v29  ;;  %v1572_v32 = vpop.permute.xlu1 %1571 }
0x15b0   :  { %v1574_v35 = vadd.f32 %v1572_v32, %v1564_v31 }
0x15b1   :  { %2194 = vtanh.f32 %v1512_v22 }
0x15b2   :  { %2196 = vtanh.f32 %v1574_v35 }
0x15bb   :  { %v2195_v36 = vpop.eup %2194 }
0x15bc   :  { %v2197_v39 = vpop.eup %2196  ;;  %1515 = vrot.lane.b32.xlu0 %v2195_v36, %s2301_s21 }
0x15bd   :  { %1577 = vrot.lane.b32.xlu1 %v2197_v39, %s2301_s21 }
0x162e   :  { %v1516_v10 = vpop.permute.xlu0 %1515 }
0x162f   :  { %v1518_v43 = vmul.f32 %v1516_v10, %v1501_v23  ;;  %v1578_v40 = vpop.permute.xlu1 %1577 }
0x1630   :  { %v1580_v41 = vmul.f32 %v1578_v40, %v1563_v24 }
0x1631   :  { %v1582_v42 = vpack.c.bf16 %v1518_v43, %v1518_v43 }
0x1632   :  { %v1581_v47 = vpack.c.bf16 %v1580_v41, %v1580_v41 }
0x1633   :  { %1584 = vrot.lane.b32.xlu0 %v1582_v42, %s2309_s1 }
0x1634   :  { %1630 = vrot.lane.b32.xlu1 %v1581_v47, %s2309_s1 }
0x16a5   :  { %v1585_v48 = vpop.permute.xlu0 %1584 }
0x16a6   :  { %v1631_v49 = vpop.permute.xlu1 %1630  ;;  %2094 = vmatmul.mubr.msk.bf16.vlgmr.msra.gmra.mrb[48].mxu0 %vm156_vm1, %v1585_v48 }
0x16a7   :  { %2102 = vmatmul.mubr.msk.bf16.vlgmr.msra.gmra.mrb[48].mxu1 %vm156_vm1, %v1631_v49  ;;  %2109 = vmatprep.mubr.msk.bf16.mxu0 %vm2306_vm0, %v2305_v0 }
0x1779   :  { %v1623_v50 = vpop.f32.mrb[48].mxu0 }
0x177a   :  { %v1669_v46 = vpop.f32.mrb[48].mxu1  ;;  %v2095_v51 = vpop.f32.mrb[49].mxu0 }
0x177b   :  { %v1670_v52 = vadd.f32 %v1669_v46, %v1623_v50  ;;  %v2103_v54 = vpop.f32.mrb[49].mxu1  ;;  %v1626_v55 = vpop.f32.mrb[50].mxu0 }
0x177c   :  { %v1672_v56 = vpop.f32.mrb[50].mxu1  ;;  %v2096_v57 = vpop.f32.mrb[51].mxu0 }
0x177d   :  { %v1675_v58 = vadd.f32 %v2535_v53, %v1670_v52  ;;  %v2104_v59 = vpop.f32.mrb[51].mxu1  ;;  %v2136_v53 = vld [vmem:[%s2858_s7] sm:$0xff]  }
0x177e   :  { %2106 = vmatpush3.bf16.msra.mxu0 %v2136_v53 }
0x177f   :  { %v1676_v44 = vmul.f32 %v1675_v58, %v2460_v19  ;;  %2107 = vmatprep.subr.bf16.mxu0 %v2305_v0 }
0x1781   :  { %2198 = vtanh.f32 %v1676_v44 }
0x178b   :  { %v2199_v60 = vpop.eup %2198 }
0x178c   :  { %v1678_v61 = vmul.f32 %v2199_v60, %v2460_v19  ;;  %v2137_v19 = vld [vmem:[%s2858_s7 + $0x8] sm:$0xff]  }
0x178d   :  { %2108 = vmatpush3.bf16.msra.mxu0 %v2137_v19 }
0x178e   :  { %v1679_v16 = vadd.f32 %v1678_v61, %v2465_v25 }
0x1790   :  { %1682 = vrot.lane.b32.xlu0 %v1679_v16, %s2301_s21  ;;  %v1680_v63 = vmul.f32 %v1679_v16, %v1512_v22 }
0x1802   :  { %v1683_v62 = vpop.permute.xlu0 %1682 }
0x1803   :  { %v1685_v33 = vmul.f32 %v1683_v62, %v1679_v16 }
0x1805   :  { %1687 = vrot.lane.b32.xlu1 %v1685_v33, %s2309_s1 }
0x1877   :  { %v1688_v1 = vpop.permute.xlu1 %1687 }
0x1878   :  { %v1690_v3 = vadd.f32 %v1688_v1, %v1680_v63 }
0x187a   :  { %2200 = vtanh.f32 %v1690_v3 }
0x1884   :  { %v2201_v25 = vpop.eup %2200 }
0x1885   :  { %1693 = vrot.lane.b32.xlu0 %v2201_v25, %s2301_s21 }
0x18f7   :  { %v1694_v5 = vpop.permute.xlu0 %1693 }
0x18f8   :  { %v1696_v6 = vmul.f32 %v1694_v5, %v1679_v16 }
0x18fa   :  { %v1697_v7 = vpack.c.bf16 %v1696_v6, %v1696_v6 }
0x18fc   :  { %1710 = vrot.lane.b32.xlu1 %v1697_v7, %s2309_s1 }
0x196e   :  { %v1711_v11 = vpop.permute.xlu1 %1710 }
0x196f   :  { %2110 = vmatmul.mubr.msk.bf16.vlgmr.msra.gmra.mrb[52].mxu0 %vm156_vm1, %v1711_v11 }
0x1a42   :  { %v1761_v8 = vpop.f32.mrb[52].mxu0 }
0x1a43   :  { %v1762_v9 = vadd.f32 %v1816_v34, %v1761_v8  ;;  %v2111_v0 = vpop.f32.mrb[53].mxu0 }
0x1a44   :  { %v1764_v2 = vpop.f32.mrb[54].mxu0 }
0x1a45   :  { %1768 = vst.msk [vmem:[%s2860_s9] sm:$0xff] %vm1767_vm5, %v1762_v9  ;;  %v2112_v4 = vpop.f32.mrb[55].mxu0 }
0x1a46   :  { %1773 = vsyncpa [#allocation3], 1 }
0x1a47   :  { %1774 = vsyncpa [#allocation5], 1 }
0x1a48   :  { %1775 = vsyncpa [#allocation8], 1 }

</bundles_post_ra>
